<compile_context>
chip_gen: v5e
topology: v5e:2x2
jax: 0.10.0
libtpu: 0.0.40
codegen_flags: <defaults>
</compile_context>

<pallas_src>
import math
import functools

import numpy as np
import jax
import jax.numpy as jnp
from jax.experimental import pallas as pl
from jax.experimental.pallas import tpu as pltpu


_LAYER_PARAM_ORDER = ('a1', 'bn1', 'wqkv', 'bqkv', 'wo', 'bo',
                      'a2', 'bn2', 'w1', 'bf1', 'w2', 'bf2')


# ----------------------------- in-kernel helpers -----------------------------

def _norm(x, alpha, bias, eps, d):
    """PyTorch NormLayer: alpha*(x-mean)/(x.std()+eps)+bias, std unbiased (d-1)."""
    mean = jnp.mean(x, axis=-1, keepdims=True)
    xc = x - mean
    var = jnp.sum(xc * xc, axis=-1, keepdims=True) * (1.0 / (d - 1))
    inv = pl.reciprocal(jnp.sqrt(var) + eps, approx=True)   # divide on EUP slot
    return alpha * xc * inv + bias


def _softmax_lastdim(s):
    m = jnp.max(s, axis=-1, keepdims=True)
    e = jnp.exp(s - m)
    return e * pl.reciprocal(jnp.sum(e, axis=-1, keepdims=True), approx=True)


# ------------------------- fused encoder kernel ------------------------------

def encoder_kernel(x_ref, mb_ref,
                   a1_ref, bn1_ref, wqkv_ref, bqkv_ref, wo_ref, bo_ref,
                   a2_ref, bn2_ref, w1_ref, bf1_ref, w2_ref, bf2_ref,
                   af_ref, bf_ref,
                   o_ref, x_vmem,
                   *, S, D, heads, eps):
    n = pl.program_id(1)                      # layer index (inner, "arbitrary")
    d_k = D // heads

    # First layer step of this batch block: load (embed*sqrt(D) + PE) rows.
    @pl.when(n == 0)
    def _():
        x_vmem[...] = x_ref[...]

    x = x_vmem[...]                                            # [S, D] f32

    # ---- sub-layer 1: pre-norm + multi-head attention + residual ----
    xn = _norm(x, a1_ref[...], bn1_ref[...], eps, D)
    qkv = jnp.dot(xn.astype(jnp.bfloat16), wqkv_ref[...],
                  preferred_element_type=jnp.float32) + bqkv_ref[...]   # [S, 3D]
    # 1/sqrt(d_k) is already folded into the q weights/bias (wrapper).
    q = qkv[:, :D]
    k = qkv[:, D:2 * D]
    v = qkv[:, 2 * D:]

    def heads_first(t):
        # [S, D] -> [heads, S, d_k]; `heads` static lane slices + one stack
        # (Mosaic-safe; avoids a (1,0,2) transpose of non-minor dims).
        return jnp.stack([t[:, h * d_k:(h + 1) * d_k] for h in range(heads)])

    qh = heads_first(q).astype(jnp.bfloat16)
    kh = heads_first(k).astype(jnp.bfloat16)
    vh = heads_first(v).astype(jnp.bfloat16)

    # Batched over heads; leading batch dim for clean MXU lowering.
    scores = jnp.einsum('hqd,hkd->hqk', qh, kh,
                        preferred_element_type=jnp.float32)    # [heads, S, S]
    scores = scores + mb_ref[...]                              # bias broadcast over heads
    probs = _softmax_lastdim(scores)
    # TODO(synk): for large S, block over query tiles with online softmax
    # instead of materializing the full [heads, S, S] slab.
    attn = jnp.einsum('hqk,hkd->hqd', probs.astype(jnp.bfloat16), vh,
                      preferred_element_type=jnp.float32)      # [heads, S, d_k]

    concat = jnp.concatenate([attn[h] for h in range(heads)], axis=-1)  # [S, D]
    attn_out = jnp.dot(concat.astype(jnp.bfloat16), wo_ref[...],
                       preferred_element_type=jnp.float32) + bo_ref[...]
    x = x + attn_out                                           # dropout_1 = identity

    # ---- sub-layer 2: pre-norm + feed-forward + residual ----
    xn2 = _norm(x, a2_ref[...], bn2_ref[...], eps, D)
    h1 = jnp.dot(xn2.astype(jnp.bfloat16), w1_ref[...],
                 preferred_element_type=jnp.float32) + bf1_ref[...]
    h1 = jnp.maximum(h1, 0.0)                                  # ReLU; FF dropout = identity
    ff = jnp.dot(h1.astype(jnp.bfloat16), w2_ref[...],
                 preferred_element_type=jnp.float32) + bf2_ref[...]
    x = x + ff                                                 # dropout_2 = identity

    x_vmem[...] = x                                            # carry to next layer

    # Last layer: final NormLayer, single HBM writeback for this batch block.
    @pl.when(n == pl.num_programs(1) - 1)
    def _():
        o_ref[...] = _norm(x, af_ref[...], bf_ref[...], eps, D)


# ------------------------------ parameter init ------------------------------

def build_pe_table(d_model, max_seq_len=100):
    # Exact replication of the PyTorch PositionalEncoder __init__ loop
    pe = np.zeros((max_seq_len, d_model), dtype=np.float32)
    for pos in range(max_seq_len):
        for i in range(0, d_model, 2):
            pe[pos, i] = math.sin(pos / 10000 ** (2 * i / d_model))
            pe[pos, i + 1] = math.cos(pos / 10000 ** (2 * (i + 1) / d_model))
    return jnp.asarray(pe)


def init_params(key, vocab_size, d_model, N, heads, d_ff=2048):
    def lin(k, din, dout):
        kw, kb = jax.random.split(k)
        w = jax.random.normal(kw, (din, dout), jnp.float32) / math.sqrt(din)
        b = jax.random.normal(kb, (1, dout), jnp.float32) * 0.01
        return w, b

    keys = jax.random.split(key, N + 1)
    params = {
        'embed': jax.random.normal(keys[0], (vocab_size, d_model), jnp.float32) * 0.02,
        'pe': build_pe_table(d_model),
        'norm_a': jnp.ones((1, d_model), jnp.float32),
        'norm_b': jnp.zeros((1, d_model), jnp.float32),
        'layers': [],
    }
    for n in range(N):
        lk = jax.random.split(keys[n + 1], 6)
        wq, bq = lin(lk[0], d_model, d_model)
        wk, bk = lin(lk[1], d_model, d_model)
        wv, bv = lin(lk[2], d_model, d_model)
        wo, bo = lin(lk[3], d_model, d_model)
        w1, bf1 = lin(lk[4], d_model, d_ff)
        w2, bf2 = lin(lk[5], d_ff, d_model)
        params['layers'].append(dict(
            a1=jnp.ones((1, d_model), jnp.float32),
            bn1=jnp.zeros((1, d_model), jnp.float32),
            wq=wq, bq=bq, wk=wk, bk=bk, wv=wv, bv=bv, wo=wo, bo=bo,
            a2=jnp.ones((1, d_model), jnp.float32),
            bn2=jnp.zeros((1, d_model), jnp.float32),
            w1=w1, bf1=bf1, w2=w2, bf2=bf2,
        ))
    return params


# ------------------------------ encoder forward ------------------------------

def encoder_forward(src, mask, params, *, d_model, heads, eps=1e-6):
    B, S = src.shape
    D = d_model
    N = len(params['layers'])
    d_ff = params['layers'][0]['w1'].shape[-1]
    d_k = D // heads
    inv_sqrt_dk = 1.0 / math.sqrt(d_k)

    # TODO(synk): the embedding lookup is a data-dependent gather; kept in XLA glue.
    x = jnp.take(params['embed'], src, axis=0)                     # [B, S, D]
    # PositionalEncoder fused into the wrapper: x*sqrt(d_model) + pe (trivially
    # fused by XLA; removes a resident VMEM buffer + DMA stream from the kernel).
    x = (x * math.sqrt(d_model) + params['pe'][:S][None]).astype(jnp.float32)
    # mask==1 -> -1e9 additive bias; NOT expanded over heads (broadcast in-kernel).
    mask_bias = jnp.where(mask == 1, -1e9, 0.0).astype(jnp.float32)   # [B, S, S]

    # Stack per-layer params with a leading N dim; one layer per grid step.
    # q/k/v fused into one [D, 3D] weight with 1/sqrt(d_k) folded into q.
    def make(name, lp):
        if name == 'wqkv':
            return jnp.concatenate([lp['wq'] * inv_sqrt_dk, lp['wk'], lp['wv']], axis=-1)
        if name == 'bqkv':
            return jnp.concatenate([lp['bq'] * inv_sqrt_dk, lp['bk'], lp['bv']], axis=-1)
        return lp[name]

    stacked = []
    for name in _LAYER_PARAM_ORDER:
        stk = jnp.stack([make(name, lp) for lp in params['layers']])   # [N, a, b]
        if name in ('wqkv', 'wo', 'w1', 'w2'):
            stk = stk.astype(jnp.bfloat16)        # MXU-native, half the DMA bytes
        stacked.append(stk)

    in_specs = [
        pl.BlockSpec((None, S, D), lambda b, n: (b, 0, 0)),      # x (PE pre-added)
        pl.BlockSpec((None, S, S), lambda b, n: (b, 0, 0)),      # mask bias [S,S]
    ]
    for w in stacked:                                            # layer params [., .]
        in_specs.append(pl.BlockSpec((None,) + w.shape[1:], lambda b, n: (n, 0, 0)))
    in_specs += [pl.BlockSpec((1, D), lambda b, n: (0, 0)),      # final norm alpha
                 pl.BlockSpec((1, D), lambda b, n: (0, 0))]      # final norm bias

    # Explicit scoped-VMEM sizing (double-buffered bf16 weights + resident block
    # + intermediates), with margin, clamped under the v7x 64 MiB physical cap.
    w_bytes = 2 * 2 * (D * 3 * D + D * D + 2 * D * d_ff)
    a_bytes = 4 * (4 * S * D + 2 * S * S)
    i_bytes = 4 * (3 * heads * S * S + 2 * S * d_ff + 2 * S * 3 * D)
    vmem_limit = int(min(max(4 * (w_bytes + a_bytes + i_bytes), 8 << 20), 56 << 20))

    out = pl.pallas_call(
        functools.partial(encoder_kernel, S=S, D=D, heads=heads, eps=eps),
        out_shape=jax.ShapeDtypeStruct((B, S, D), jnp.float32),
        grid=(B, N),                                   # (batch block, layer)
        in_specs=in_specs,
        out_specs=pl.BlockSpec((None, S, D), lambda b, n: (b, 0, 0)),
        scratch_shapes=[pltpu.VMEM((S, D), jnp.float32)],
        compiler_params=pltpu.CompilerParams(
            dimension_semantics=("parallel", "arbitrary"),
            vmem_limit_bytes=vmem_limit),
    )(x, mask_bias, *stacked, params['norm_a'], params['norm_b'])

    return out


# ----------------------------------- main ------------------------------------

if __name__ == "__main__":
    vocab_size, d_model, N, heads, dropout = 50, 32, 2, 4, 0.1
    B, S = 2, 8

    key = jax.random.PRNGKey(0)
    k_src, k_mask, k_par = jax.random.split(key, 3)

    src = jax.random.randint(k_src, (B, S), 0, vocab_size, dtype=jnp.int32)
    # mask == 1 marks attention positions to suppress (score -> -1e9),
    # matching the reference's scores.masked_fill(mask == 1, -1e9).
    mask = (jax.random.uniform(k_mask, (B, S, S)) < 0.2).astype(jnp.int32)

    params = init_params(k_par, vocab_size, d_model, N, heads)

    out = encoder_forward(src, mask, params, d_model=d_model, heads=heads)
    out = jax.block_until_ready(out)

    assert out.shape == (B, S, d_model), out.shape
    assert jnp.all(jnp.isfinite(out)), "non-finite output"
    print("KERNEL_OK")
</pallas_src>

<mosaic_0001>
module attributes {stable_mosaic.version = 11 : i64} {
  func.func @encoder_kernel(%arg0: i32, %arg1: i32, %arg2: memref<1x8x32xf32, #tpu.memory_space<vmem>>, %arg3: memref<1x8x8xf32, #tpu.memory_space<vmem>>, %arg4: memref<1x1x32xf32, #tpu.memory_space<vmem>>, %arg5: memref<1x1x32xf32, #tpu.memory_space<vmem>>, %arg6: memref<1x32x96xbf16, #tpu.memory_space<vmem>>, %arg7: memref<1x1x96xf32, #tpu.memory_space<vmem>>, %arg8: memref<1x32x32xbf16, #tpu.memory_space<vmem>>, %arg9: memref<1x1x32xf32, #tpu.memory_space<vmem>>, %arg10: memref<1x1x32xf32, #tpu.memory_space<vmem>>, %arg11: memref<1x1x32xf32, #tpu.memory_space<vmem>>, %arg12: memref<1x32x2048xbf16, #tpu.memory_space<vmem>>, %arg13: memref<1x1x2048xf32, #tpu.memory_space<vmem>>, %arg14: memref<1x2048x32xbf16, #tpu.memory_space<vmem>>, %arg15: memref<1x1x32xf32, #tpu.memory_space<vmem>>, %arg16: memref<1x32xf32, #tpu.memory_space<vmem>>, %arg17: memref<1x32xf32, #tpu.memory_space<vmem>>, %arg18: memref<1x8x32xf32, #tpu.memory_space<vmem>>, %arg19: memref<8x32xf32, #tpu.memory_space<vmem>>) attributes {dimension_semantics = [#tpu.dimension_semantics<parallel>, #tpu.dimension_semantics<arbitrary>], iteration_bounds = array<i64: 2, 2>, scalar_prefetch = 0 : i64, scratch_operands = 1 : i64, tpu.core_type = #tpu.core_type<tc>, window_params = [{transform_indices = @transform_0, window_bounds = array<i64: 1, 8, 32>}, {transform_indices = @transform_1, window_bounds = array<i64: 1, 8, 8>}, {transform_indices = @transform_2, window_bounds = array<i64: 1, 1, 32>}, {transform_indices = @transform_3, window_bounds = array<i64: 1, 1, 32>}, {transform_indices = @transform_4, window_bounds = array<i64: 1, 32, 96>}, {transform_indices = @transform_5, window_bounds = array<i64: 1, 1, 96>}, {transform_indices = @transform_6, window_bounds = array<i64: 1, 32, 32>}, {transform_indices = @transform_7, window_bounds = array<i64: 1, 1, 32>}, {transform_indices = @transform_8, window_bounds = array<i64: 1, 1, 32>}, {transform_indices = @transform_9, window_bounds = array<i64: 1, 1, 32>}, {transform_indices = @transform_10, window_bounds = array<i64: 1, 32, 2048>}, {transform_indices = @transform_11, window_bounds = array<i64: 1, 1, 2048>}, {transform_indices = @transform_12, window_bounds = array<i64: 1, 2048, 32>}, {transform_indices = @transform_13, window_bounds = array<i64: 1, 1, 32>}, {pipeline_mode = #tpu.pipeline_mode<synchronous>, transform_indices = @transform_14, window_bounds = array<i64: 1, 32>}, {pipeline_mode = #tpu.pipeline_mode<synchronous>, transform_indices = @transform_15, window_bounds = array<i64: 1, 32>}, {transform_indices = @transform_16, window_bounds = array<i64: 1, 8, 32>}]} {
    %c0_i32 = arith.constant 0 : i32
    %0 = arith.cmpi eq, %arg1, %c0_i32 : i32
    %1 = arith.extui %0 : i1 to i32
    %c0_i32_0 = arith.constant 0 : i32
    %2 = arith.cmpi ne, %1, %c0_i32_0 : i32
    scf.if %2 {
      %c0_62 = arith.constant 0 : index
      %c0_63 = arith.constant 0 : index
      %c0_64 = arith.constant 0 : index
      %154 = vector.load %arg2[%c0_62, %c0_63, %c0_64] : memref<1x8x32xf32, #tpu.memory_space<vmem>>, vector<1x8x32xf32>
      %155 = vector.shape_cast %154 : vector<1x8x32xf32> to vector<8x32xf32>
      %c0_65 = arith.constant 0 : index
      %c0_66 = arith.constant 0 : index
      %156 = vector.load %arg19[%c0_65, %c0_66] : memref<8x32xf32, #tpu.memory_space<vmem>>, vector<8x32xf32>
      tpu.vector_store %arg19[%c0_65, %c0_66], %155 {strides = array<i32>} : memref<8x32xf32, #tpu.memory_space<vmem>>, vector<8x32xf32>,
    } else {
    }
    %c0 = arith.constant 0 : index
    %c0_1 = arith.constant 0 : index
    %3 = vector.load %arg19[%c0, %c0_1] : memref<8x32xf32, #tpu.memory_space<vmem>>, vector<8x32xf32>
    %c0_2 = arith.constant 0 : index
    %c0_3 = arith.constant 0 : index
    %c0_4 = arith.constant 0 : index
    %4 = vector.load %arg4[%c0_2, %c0_3, %c0_4] : memref<1x1x32xf32, #tpu.memory_space<vmem>>, vector<1x1x32xf32>
    %5 = vector.shape_cast %4 : vector<1x1x32xf32> to vector<1x32xf32>
    %c0_5 = arith.constant 0 : index
    %c0_6 = arith.constant 0 : index
    %c0_7 = arith.constant 0 : index
    %6 = vector.load %arg5[%c0_5, %c0_6, %c0_7] : memref<1x1x32xf32, #tpu.memory_space<vmem>>, vector<1x1x32xf32>
    %7 = vector.shape_cast %6 : vector<1x1x32xf32> to vector<1x32xf32>
    %cst = arith.constant dense<0.000000e+00> : vector<8xf32>
    %8 = vector.multi_reduction <add>, %3, %cst [1] : vector<8x32xf32> to vector<8xf32>
    %9 = vector.shape_cast %8 : vector<8xf32> to vector<8x1xf32>
    %cst_8 = arith.constant 3.200000e+01 : f32
    %10 = vector.broadcast %cst_8 : f32 to vector<8x1xf32>
    %11 = arith.divf %9, %10 : vector<8x1xf32>
    %12 = vector.broadcast %11 : vector<8x1xf32> to vector<8x32xf32>
    %13 = arith.subf %3, %12 : vector<8x32xf32>
    %14 = arith.mulf %13, %13 : vector<8x32xf32>
    %cst_9 = arith.constant dense<0.000000e+00> : vector<8xf32>
    %15 = vector.multi_reduction <add>, %14, %cst_9 [1] : vector<8x32xf32> to vector<8xf32>
    %16 = vector.shape_cast %15 : vector<8xf32> to vector<8x1xf32>
    %cst_10 = arith.constant 0.0322580636 : f32
    %17 = vector.broadcast %cst_10 : f32 to vector<8x1xf32>
    %18 = arith.mulf %16, %17 : vector<8x1xf32>
    %19 = math.sqrt %18 : vector<8x1xf32>
    %cst_11 = arith.constant 9.99999997E-7 : f32
    %20 = vector.broadcast %cst_11 : f32 to vector<8x1xf32>
    %21 = arith.addf %19, %20 : vector<8x1xf32>
    %22 = tpu.reciprocal %21 {approx = true} : vector<8x1xf32> -> vector<8x1xf32>
    %23 = vector.broadcast %5 : vector<1x32xf32> to vector<8x32xf32>
    %24 = arith.mulf %23, %13 : vector<8x32xf32>
    %25 = vector.broadcast %22 : vector<8x1xf32> to vector<8x32xf32>
    %26 = arith.mulf %24, %25 : vector<8x32xf32>
    %27 = vector.broadcast %7 : vector<1x32xf32> to vector<8x32xf32>
    %28 = arith.addf %26, %27 : vector<8x32xf32>
    %29 = arith.truncf %28 : vector<8x32xf32> to vector<8x32xbf16>
    %c0_12 = arith.constant 0 : index
    %c0_13 = arith.constant 0 : index
    %c0_14 = arith.constant 0 : index
    %30 = vector.load %arg6[%c0_12, %c0_13, %c0_14] : memref<1x32x96xbf16, #tpu.memory_space<vmem>>, vector<1x32x96xbf16>
    %31 = vector.shape_cast %30 : vector<1x32x96xbf16> to vector<32x96xbf16>
    %cst_15 = arith.constant dense<0.000000e+00> : vector<8x96xf32>
    %32 = tpu.matmul %29, %31, %cst_15 {dimension_numbers = #tpu.dot_dimension_numbers<[1], [0], [0], [1], [0, 0, 1, 1], [], []>} : vector<8x32xbf16>, vector<32x96xbf16>, vector<8x96xf32> -> vector<8x96xf32>
    %c0_16 = arith.constant 0 : index
    %c0_17 = arith.constant 0 : index
    %c0_18 = arith.constant 0 : index
    %33 = vector.load %arg7[%c0_16, %c0_17, %c0_18] : memref<1x1x96xf32, #tpu.memory_space<vmem>>, vector<1x1x96xf32>
    %34 = vector.shape_cast %33 : vector<1x1x96xf32> to vector<1x96xf32>
    %35 = vector.broadcast %34 : vector<1x96xf32> to vector<8x96xf32>
    %36 = arith.addf %32, %35 : vector<8x96xf32>
    %37 = vector.extract_strided_slice %36 {offsets = [0, 0], sizes = [8, 32], strides = [1, 1]} : vector<8x96xf32> to vector<8x32xf32>
    %38 = vector.extract_strided_slice %36 {offsets = [0, 32], sizes = [8, 32], strides = [1, 1]} : vector<8x96xf32> to vector<8x32xf32>
    %39 = vector.extract_strided_slice %36 {offsets = [0, 64], sizes = [8, 32], strides = [1, 1]} : vector<8x96xf32> to vector<8x32xf32>
    %40 = vector.extract_strided_slice %37 {offsets = [0, 0], sizes = [8, 8], strides = [1, 1]} : vector<8x32xf32> to vector<8x8xf32>
    %41 = vector.extract_strided_slice %37 {offsets = [0, 8], sizes = [8, 8], strides = [1, 1]} : vector<8x32xf32> to vector<8x8xf32>
    %42 = vector.extract_strided_slice %37 {offsets = [0, 16], sizes = [8, 8], strides = [1, 1]} : vector<8x32xf32> to vector<8x8xf32>
    %43 = vector.extract_strided_slice %37 {offsets = [0, 24], sizes = [8, 8], strides = [1, 1]} : vector<8x32xf32> to vector<8x8xf32>
    %44 = vector.shape_cast %40 : vector<8x8xf32> to vector<1x8x8xf32>
    %45 = vector.shape_cast %41 : vector<8x8xf32> to vector<1x8x8xf32>
    %46 = vector.shape_cast %42 : vector<8x8xf32> to vector<1x8x8xf32>
    %47 = vector.shape_cast %43 : vector<8x8xf32> to vector<1x8x8xf32>
    %48 = tpu.concatenate %44, %45, %46, %47 in 0 : vector<1x8x8xf32>, vector<1x8x8xf32>, vector<1x8x8xf32>, vector<1x8x8xf32> -> vector<4x8x8xf32>
    %49 = arith.truncf %48 : vector<4x8x8xf32> to vector<4x8x8xbf16>
    %50 = vector.extract_strided_slice %38 {offsets = [0, 0], sizes = [8, 8], strides = [1, 1]} : vector<8x32xf32> to vector<8x8xf32>
    %51 = vector.extract_strided_slice %38 {offsets = [0, 8], sizes = [8, 8], strides = [1, 1]} : vector<8x32xf32> to vector<8x8xf32>
    %52 = vector.extract_strided_slice %38 {offsets = [0, 16], sizes = [8, 8], strides = [1, 1]} : vector<8x32xf32> to vector<8x8xf32>
    %53 = vector.extract_strided_slice %38 {offsets = [0, 24], sizes = [8, 8], strides = [1, 1]} : vector<8x32xf32> to vector<8x8xf32>
    %54 = vector.shape_cast %50 : vector<8x8xf32> to vector<1x8x8xf32>
    %55 = vector.shape_cast %51 : vector<8x8xf32> to vector<1x8x8xf32>
    %56 = vector.shape_cast %52 : vector<8x8xf32> to vector<1x8x8xf32>
    %57 = vector.shape_cast %53 : vector<8x8xf32> to vector<1x8x8xf32>
    %58 = tpu.concatenate %54, %55, %56, %57 in 0 : vector<1x8x8xf32>, vector<1x8x8xf32>, vector<1x8x8xf32>, vector<1x8x8xf32> -> vector<4x8x8xf32>
    %59 = arith.truncf %58 : vector<4x8x8xf32> to vector<4x8x8xbf16>
    %60 = vector.extract_strided_slice %39 {offsets = [0, 0], sizes = [8, 8], strides = [1, 1]} : vector<8x32xf32> to vector<8x8xf32>
    %61 = vector.extract_strided_slice %39 {offsets = [0, 8], sizes = [8, 8], strides = [1, 1]} : vector<8x32xf32> to vector<8x8xf32>
    %62 = vector.extract_strided_slice %39 {offsets = [0, 16], sizes = [8, 8], strides = [1, 1]} : vector<8x32xf32> to vector<8x8xf32>
    %63 = vector.extract_strided_slice %39 {offsets = [0, 24], sizes = [8, 8], strides = [1, 1]} : vector<8x32xf32> to vector<8x8xf32>
    %64 = vector.shape_cast %60 : vector<8x8xf32> to vector<1x8x8xf32>
    %65 = vector.shape_cast %61 : vector<8x8xf32> to vector<1x8x8xf32>
    %66 = vector.shape_cast %62 : vector<8x8xf32> to vector<1x8x8xf32>
    %67 = vector.shape_cast %63 : vector<8x8xf32> to vector<1x8x8xf32>
    %68 = tpu.concatenate %64, %65, %66, %67 in 0 : vector<1x8x8xf32>, vector<1x8x8xf32>, vector<1x8x8xf32>, vector<1x8x8xf32> -> vector<4x8x8xf32>
    %69 = arith.truncf %68 : vector<4x8x8xf32> to vector<4x8x8xbf16>
    "tpu.trace_start"() <{level = 10 : i32, message = "hqd,hkd->hqk"}> : () -> ()
    %cst_19 = arith.constant dense<0.000000e+00> : vector<4x8x8xf32>
    %70 = tpu.matmul %49, %59, %cst_19 {dimension_numbers = #tpu.dot_dimension_numbers<[2], [2], [1], [1], [0, 0, 0, 1, 1, 1], [0], [0]>} : vector<4x8x8xbf16>, vector<4x8x8xbf16>, vector<4x8x8xf32> -> vector<4x8x8xf32>
    "tpu.trace_stop"() : () -> ()
    %c0_20 = arith.constant 0 : index
    %c0_21 = arith.constant 0 : index
    %c0_22 = arith.constant 0 : index
    %71 = vector.load %arg3[%c0_20, %c0_21, %c0_22] : memref<1x8x8xf32, #tpu.memory_space<vmem>>, vector<1x8x8xf32>
    %72 = vector.shape_cast %71 : vector<1x8x8xf32> to vector<8x8xf32>
    %73 = vector.shape_cast %72 : vector<8x8xf32> to vector<1x8x8xf32>
    %74 = vector.broadcast %73 : vector<1x8x8xf32> to vector<4x8x8xf32>
    %75 = arith.addf %70, %74 : vector<4x8x8xf32>
    %cst_23 = arith.constant dense<0xFF800000> : vector<4x8xf32>
    %76 = vector.multi_reduction <maximumf>, %75, %cst_23 [2] : vector<4x8x8xf32> to vector<4x8xf32>
    %77 = vector.shape_cast %76 : vector<4x8xf32> to vector<4x8x1xf32>
    %78 = vector.broadcast %77 : vector<4x8x1xf32> to vector<4x8x8xf32>
    %79 = arith.subf %75, %78 : vector<4x8x8xf32>
    %80 = math.exp %79 : vector<4x8x8xf32>
    %cst_24 = arith.constant dense<0.000000e+00> : vector<4x8xf32>
    %81 = vector.multi_reduction <add>, %80, %cst_24 [2] : vector<4x8x8xf32> to vector<4x8xf32>
    %82 = vector.shape_cast %81 : vector<4x8xf32> to vector<4x8x1xf32>
    %83 = tpu.reciprocal %82 {approx = true} : vector<4x8x1xf32> -> vector<4x8x1xf32>
    %84 = vector.broadcast %83 : vector<4x8x1xf32> to vector<4x8x8xf32>
    %85 = arith.mulf %80, %84 : vector<4x8x8xf32>
    %86 = arith.truncf %85 : vector<4x8x8xf32> to vector<4x8x8xbf16>
    "tpu.trace_start"() <{level = 10 : i32, message = "hqk,hkd->hqd"}> : () -> ()
    %cst_25 = arith.constant dense<0.000000e+00> : vector<4x8x8xf32>
    %87 = tpu.matmul %86, %69, %cst_25 {dimension_numbers = #tpu.dot_dimension_numbers<[2], [1], [1], [2], [0, 0, 0, 1, 1, 2], [0], [0]>} : vector<4x8x8xbf16>, vector<4x8x8xbf16>, vector<4x8x8xf32> -> vector<4x8x8xf32>
    "tpu.trace_stop"() : () -> ()
    %88 = vector.extract_strided_slice %87 {offsets = [0, 0, 0], sizes = [1, 8, 8], strides = [1, 1, 1]} : vector<4x8x8xf32> to vector<1x8x8xf32>
    %89 = vector.shape_cast %88 : vector<1x8x8xf32> to vector<8x8xf32>
    %90 = vector.extract_strided_slice %87 {offsets = [1, 0, 0], sizes = [1, 8, 8], strides = [1, 1, 1]} : vector<4x8x8xf32> to vector<1x8x8xf32>
    %91 = vector.shape_cast %90 : vector<1x8x8xf32> to vector<8x8xf32>
    %92 = vector.extract_strided_slice %87 {offsets = [2, 0, 0], sizes = [1, 8, 8], strides = [1, 1, 1]} : vector<4x8x8xf32> to vector<1x8x8xf32>
    %93 = vector.shape_cast %92 : vector<1x8x8xf32> to vector<8x8xf32>
    %94 = vector.extract_strided_slice %87 {offsets = [3, 0, 0], sizes = [1, 8, 8], strides = [1, 1, 1]} : vector<4x8x8xf32> to vector<1x8x8xf32>
    %95 = vector.shape_cast %94 : vector<1x8x8xf32> to vector<8x8xf32>
    %96 = tpu.concatenate %89, %91, %93, %95 in 1 : vector<8x8xf32>, vector<8x8xf32>, vector<8x8xf32>, vector<8x8xf32> -> vector<8x32xf32>
    %97 = arith.truncf %96 : vector<8x32xf32> to vector<8x32xbf16>
    %c0_26 = arith.constant 0 : index
    %c0_27 = arith.constant 0 : index
    %c0_28 = arith.constant 0 : index
    %98 = vector.load %arg8[%c0_26, %c0_27, %c0_28] : memref<1x32x32xbf16, #tpu.memory_space<vmem>>, vector<1x32x32xbf16>
    %99 = vector.shape_cast %98 : vector<1x32x32xbf16> to vector<32x32xbf16>
    %cst_29 = arith.constant dense<0.000000e+00> : vector<8x32xf32>
    %100 = tpu.matmul %97, %99, %cst_29 {dimension_numbers = #tpu.dot_dimension_numbers<[1], [0], [0], [1], [0, 0, 1, 1], [], []>} : vector<8x32xbf16>, vector<32x32xbf16>, vector<8x32xf32> -> vector<8x32xf32>
    %c0_30 = arith.constant 0 : index
    %c0_31 = arith.constant 0 : index
    %c0_32 = arith.constant 0 : index
    %101 = vector.load %arg9[%c0_30, %c0_31, %c0_32] : memref<1x1x32xf32, #tpu.memory_space<vmem>>, vector<1x1x32xf32>
    %102 = vector.shape_cast %101 : vector<1x1x32xf32> to vector<1x32xf32>
    %103 = vector.broadcast %102 : vector<1x32xf32> to vector<8x32xf32>
    %104 = arith.addf %100, %103 : vector<8x32xf32>
    %105 = arith.addf %3, %104 : vector<8x32xf32>
    %c0_33 = arith.constant 0 : index
    %c0_34 = arith.constant 0 : index
    %c0_35 = arith.constant 0 : index
    %106 = vector.load %arg10[%c0_33, %c0_34, %c0_35] : memref<1x1x32xf32, #tpu.memory_space<vmem>>, vector<1x1x32xf32>
    %107 = vector.shape_cast %106 : vector<1x1x32xf32> to vector<1x32xf32>
    %c0_36 = arith.constant 0 : index
    %c0_37 = arith.constant 0 : index
    %c0_38 = arith.constant 0 : index
    %108 = vector.load %arg11[%c0_36, %c0_37, %c0_38] : memref<1x1x32xf32, #tpu.memory_space<vmem>>, vector<1x1x32xf32>
    %109 = vector.shape_cast %108 : vector<1x1x32xf32> to vector<1x32xf32>
    %cst_39 = arith.constant dense<0.000000e+00> : vector<8xf32>
    %110 = vector.multi_reduction <add>, %105, %cst_39 [1] : vector<8x32xf32> to vector<8xf32>
    %111 = vector.shape_cast %110 : vector<8xf32> to vector<8x1xf32>
    %cst_40 = arith.constant 3.200000e+01 : f32
    %112 = vector.broadcast %cst_40 : f32 to vector<8x1xf32>
    %113 = arith.divf %111, %112 : vector<8x1xf32>
    %114 = vector.broadcast %113 : vector<8x1xf32> to vector<8x32xf32>
    %115 = arith.subf %105, %114 : vector<8x32xf32>
    %116 = arith.mulf %115, %115 : vector<8x32xf32>
    %cst_41 = arith.constant dense<0.000000e+00> : vector<8xf32>
    %117 = vector.multi_reduction <add>, %116, %cst_41 [1] : vector<8x32xf32> to vector<8xf32>
    %118 = vector.shape_cast %117 : vector<8xf32> to vector<8x1xf32>
    %cst_42 = arith.constant 0.0322580636 : f32
    %119 = vector.broadcast %cst_42 : f32 to vector<8x1xf32>
    %120 = arith.mulf %118, %119 : vector<8x1xf32>
    %121 = math.sqrt %120 : vector<8x1xf32>
    %cst_43 = arith.constant 9.99999997E-7 : f32
    %122 = vector.broadcast %cst_43 : f32 to vector<8x1xf32>
    %123 = arith.addf %121, %122 : vector<8x1xf32>
    %124 = tpu.reciprocal %123 {approx = true} : vector<8x1xf32> -> vector<8x1xf32>
    %125 = vector.broadcast %107 : vector<1x32xf32> to vector<8x32xf32>
    %126 = arith.mulf %125, %115 : vector<8x32xf32>
    %127 = vector.broadcast %124 : vector<8x1xf32> to vector<8x32xf32>
    %128 = arith.mulf %126, %127 : vector<8x32xf32>
    %129 = vector.broadcast %109 : vector<1x32xf32> to vector<8x32xf32>
    %130 = arith.addf %128, %129 : vector<8x32xf32>
    %131 = arith.truncf %130 : vector<8x32xf32> to vector<8x32xbf16>
    %c0_44 = arith.constant 0 : index
    %c0_45 = arith.constant 0 : index
    %c0_46 = arith.constant 0 : index
    %132 = vector.load %arg12[%c0_44, %c0_45, %c0_46] : memref<1x32x2048xbf16, #tpu.memory_space<vmem>>, vector<1x32x2048xbf16>
    %133 = vector.shape_cast %132 : vector<1x32x2048xbf16> to vector<32x2048xbf16>
    %cst_47 = arith.constant dense<0.000000e+00> : vector<8x2048xf32>
    %134 = tpu.matmul %131, %133, %cst_47 {dimension_numbers = #tpu.dot_dimension_numbers<[1], [0], [0], [1], [0, 0, 1, 1], [], []>} : vector<8x32xbf16>, vector<32x2048xbf16>, vector<8x2048xf32> -> vector<8x2048xf32>
    %c0_48 = arith.constant 0 : index
    %c0_49 = arith.constant 0 : index
    %c0_50 = arith.constant 0 : index
    %135 = vector.load %arg13[%c0_48, %c0_49, %c0_50] : memref<1x1x2048xf32, #tpu.memory_space<vmem>>, vector<1x1x2048xf32>
    %136 = vector.shape_cast %135 : vector<1x1x2048xf32> to vector<1x2048xf32>
    %137 = vector.broadcast %136 : vector<1x2048xf32> to vector<8x2048xf32>
    %138 = arith.addf %134, %137 : vector<8x2048xf32>
    %cst_51 = arith.constant 0.000000e+00 : f32
    %139 = vector.broadcast %cst_51 : f32 to vector<8x2048xf32>
    %140 = arith.maximumf %138, %139 : vector<8x2048xf32>
    %141 = arith.truncf %140 : vector<8x2048xf32> to vector<8x2048xbf16>
    %c0_52 = arith.constant 0 : index
    %c0_53 = arith.constant 0 : index
    %c0_54 = arith.constant 0 : index
    %142 = vector.load %arg14[%c0_52, %c0_53, %c0_54] : memref<1x2048x32xbf16, #tpu.memory_space<vmem>>, vector<1x2048x32xbf16>
    %143 = vector.shape_cast %142 : vector<1x2048x32xbf16> to vector<2048x32xbf16>
    %cst_55 = arith.constant dense<0.000000e+00> : vector<8x32xf32>
    %144 = tpu.matmul %141, %143, %cst_55 {dimension_numbers = #tpu.dot_dimension_numbers<[1], [0], [0], [1], [0, 0, 1, 1], [], []>} : vector<8x2048xbf16>, vector<2048x32xbf16>, vector<8x32xf32> -> vector<8x32xf32>
    %c0_56 = arith.constant 0 : index
    %c0_57 = arith.constant 0 : index
    %c0_58 = arith.constant 0 : index
    %145 = vector.load %arg15[%c0_56, %c0_57, %c0_58] : memref<1x1x32xf32, #tpu.memory_space<vmem>>, vector<1x1x32xf32>
    %146 = vector.shape_cast %145 : vector<1x1x32xf32> to vector<1x32xf32>
    %147 = vector.broadcast %146 : vector<1x32xf32> to vector<8x32xf32>
    %148 = arith.addf %144, %147 : vector<8x32xf32>
    %149 = arith.addf %105, %148 : vector<8x32xf32>
    %c0_59 = arith.constant 0 : index
    %c0_60 = arith.constant 0 : index
    %150 = vector.load %arg19[%c0_59, %c0_60] : memref<8x32xf32, #tpu.memory_space<vmem>>, vector<8x32xf32>
    tpu.vector_store %arg19[%c0_59, %c0_60], %149 {strides = array<i32>} : memref<8x32xf32, #tpu.memory_space<vmem>>, vector<8x32xf32>,
    %c1_i32 = arith.constant 1 : i32
    %151 = arith.cmpi eq, %arg1, %c1_i32 : i32
    %152 = arith.extui %151 : i1 to i32
    %c0_i32_61 = arith.constant 0 : i32
    %153 = arith.cmpi ne, %152, %c0_i32_61 : i32
    scf.if %153 {
      %c0_62 = arith.constant 0 : index
      %c0_63 = arith.constant 0 : index
      %154 = vector.load %arg16[%c0_62, %c0_63] : memref<1x32xf32, #tpu.memory_space<vmem>>, vector<1x32xf32>
      %c0_64 = arith.constant 0 : index
      %c0_65 = arith.constant 0 : index
      %155 = vector.load %arg17[%c0_64, %c0_65] : memref<1x32xf32, #tpu.memory_space<vmem>>, vector<1x32xf32>
      %cst_66 = arith.constant dense<0.000000e+00> : vector<8xf32>
      %156 = vector.multi_reduction <add>, %149, %cst_66 [1] : vector<8x32xf32> to vector<8xf32>
      %157 = vector.shape_cast %156 : vector<8xf32> to vector<8x1xf32>
      %cst_67 = arith.constant 3.200000e+01 : f32
      %158 = vector.broadcast %cst_67 : f32 to vector<8x1xf32>
      %159 = arith.divf %157, %158 : vector<8x1xf32>
      %160 = vector.broadcast %159 : vector<8x1xf32> to vector<8x32xf32>
      %161 = arith.subf %149, %160 : vector<8x32xf32>
      %162 = arith.mulf %161, %161 : vector<8x32xf32>
      %cst_68 = arith.constant dense<0.000000e+00> : vector<8xf32>
      %163 = vector.multi_reduction <add>, %162, %cst_68 [1] : vector<8x32xf32> to vector<8xf32>
      %164 = vector.shape_cast %163 : vector<8xf32> to vector<8x1xf32>
      %cst_69 = arith.constant 0.0322580636 : f32
      %165 = vector.broadcast %cst_69 : f32 to vector<8x1xf32>
      %166 = arith.mulf %164, %165 : vector<8x1xf32>
      %167 = math.sqrt %166 : vector<8x1xf32>
      %cst_70 = arith.constant 9.99999997E-7 : f32
      %168 = vector.broadcast %cst_70 : f32 to vector<8x1xf32>
      %169 = arith.addf %167, %168 : vector<8x1xf32>
      %170 = tpu.reciprocal %169 {approx = true} : vector<8x1xf32> -> vector<8x1xf32>
      %171 = vector.broadcast %154 : vector<1x32xf32> to vector<8x32xf32>
      %172 = arith.mulf %171, %161 : vector<8x32xf32>
      %173 = vector.broadcast %170 : vector<8x1xf32> to vector<8x32xf32>
      %174 = arith.mulf %172, %173 : vector<8x32xf32>
      %175 = vector.broadcast %155 : vector<1x32xf32> to vector<8x32xf32>
      %176 = arith.addf %174, %175 : vector<8x32xf32>
      %c0_71 = arith.constant 0 : index
      %c0_72 = arith.constant 0 : index
      %c0_73 = arith.constant 0 : index
      %177 = vector.load %arg18[%c0_71, %c0_72, %c0_73] : memref<1x8x32xf32, #tpu.memory_space<vmem>>, vector<1x8x32xf32>
      %178 = vector.shape_cast %177 : vector<1x8x32xf32> to vector<8x32xf32>
      %179 = vector.shape_cast %176 : vector<8x32xf32> to vector<1x8x32xf32>
      tpu.vector_store %arg18[%c0_71, %c0_72, %c0_73], %179 {strides = array<i32>} : memref<1x8x32xf32, #tpu.memory_space<vmem>>, vector<1x8x32xf32>,
    } else {
    }
    return
  }
  func.func @transform_0(%arg0: i32, %arg1: i32) -> (i32, i32, i32) {
    %c0_i32 = arith.constant 0 : i32
    %c0_i32_0 = arith.constant 0 : i32
    %c0_i32_1 = arith.constant 0 : i32
    return %arg0, %c0_i32, %c0_i32_0 : i32, i32, i32
  }
  func.func @transform_1(%arg0: i32, %arg1: i32) -> (i32, i32, i32) {
    %c0_i32 = arith.constant 0 : i32
    %c0_i32_0 = arith.constant 0 : i32
    %c0_i32_1 = arith.constant 0 : i32
    return %arg0, %c0_i32, %c0_i32_0 : i32, i32, i32
  }
  func.func @transform_2(%arg0: i32, %arg1: i32) -> (i32, i32, i32) {
    %c0_i32 = arith.constant 0 : i32
    %c0_i32_0 = arith.constant 0 : i32
    %c0_i32_1 = arith.constant 0 : i32
    return %arg1, %c0_i32, %c0_i32_0 : i32, i32, i32
  }
  func.func @transform_3(%arg0: i32, %arg1: i32) -> (i32, i32, i32) {
    %c0_i32 = arith.constant 0 : i32
    %c0_i32_0 = arith.constant 0 : i32
    %c0_i32_1 = arith.constant 0 : i32
    return %arg1, %c0_i32, %c0_i32_0 : i32, i32, i32
  }
  func.func @transform_4(%arg0: i32, %arg1: i32) -> (i32, i32, i32) {
    %c0_i32 = arith.constant 0 : i32
    %c0_i32_0 = arith.constant 0 : i32
    %c0_i32_1 = arith.constant 0 : i32
    return %arg1, %c0_i32, %c0_i32_0 : i32, i32, i32
  }
  func.func @transform_5(%arg0: i32, %arg1: i32) -> (i32, i32, i32) {
    %c0_i32 = arith.constant 0 : i32
    %c0_i32_0 = arith.constant 0 : i32
    %c0_i32_1 = arith.constant 0 : i32
    return %arg1, %c0_i32, %c0_i32_0 : i32, i32, i32
  }
  func.func @transform_6(%arg0: i32, %arg1: i32) -> (i32, i32, i32) {
    %c0_i32 = arith.constant 0 : i32
    %c0_i32_0 = arith.constant 0 : i32
    %c0_i32_1 = arith.constant 0 : i32
    return %arg1, %c0_i32, %c0_i32_0 : i32, i32, i32
  }
  func.func @transform_7(%arg0: i32, %arg1: i32) -> (i32, i32, i32) {
    %c0_i32 = arith.constant 0 : i32
    %c0_i32_0 = arith.constant 0 : i32
    %c0_i32_1 = arith.constant 0 : i32
    return %arg1, %c0_i32, %c0_i32_0 : i32, i32, i32
  }
  func.func @transform_8(%arg0: i32, %arg1: i32) -> (i32, i32, i32) {
    %c0_i32 = arith.constant 0 : i32
    %c0_i32_0 = arith.constant 0 : i32
    %c0_i32_1 = arith.constant 0 : i32
    return %arg1, %c0_i32, %c0_i32_0 : i32, i32, i32
  }
  func.func @transform_9(%arg0: i32, %arg1: i32) -> (i32, i32, i32) {
    %c0_i32 = arith.constant 0 : i32
    %c0_i32_0 = arith.constant 0 : i32
    %c0_i32_1 = arith.constant 0 : i32
    return %arg1, %c0_i32, %c0_i32_0 : i32, i32, i32
  }
  func.func @transform_10(%arg0: i32, %arg1: i32) -> (i32, i32, i32) {
    %c0_i32 = arith.constant 0 : i32
    %c0_i32_0 = arith.constant 0 : i32
    %c0_i32_1 = arith.constant 0 : i32
    return %arg1, %c0_i32, %c0_i32_0 : i32, i32, i32
  }
  func.func @transform_11(%arg0: i32, %arg1: i32) -> (i32, i32, i32) {
    %c0_i32 = arith.constant 0 : i32
    %c0_i32_0 = arith.constant 0 : i32
    %c0_i32_1 = arith.constant 0 : i32
    return %arg1, %c0_i32, %c0_i32_0 : i32, i32, i32
  }
  func.func @transform_12(%arg0: i32, %arg1: i32) -> (i32, i32, i32) {
    %c0_i32 = arith.constant 0 : i32
    %c0_i32_0 = arith.constant 0 : i32
    %c0_i32_1 = arith.constant 0 : i32
    return %arg1, %c0_i32, %c0_i32_0 : i32, i32, i32
  }
  func.func @transform_13(%arg0: i32, %arg1: i32) -> (i32, i32, i32) {
    %c0_i32 = arith.constant 0 : i32
    %c0_i32_0 = arith.constant 0 : i32
    %c0_i32_1 = arith.constant 0 : i32
    return %arg1, %c0_i32, %c0_i32_0 : i32, i32, i32
  }
  func.func @transform_14(%arg0: i32, %arg1: i32) -> (i32, i32) {
    %c0_i32 = arith.constant 0 : i32
    %c0_i32_0 = arith.constant 0 : i32
    %c0_i32_1 = arith.constant 0 : i32
    return %c0_i32, %c0_i32_0 : i32, i32
  }
  func.func @transform_15(%arg0: i32, %arg1: i32) -> (i32, i32) {
    %c0_i32 = arith.constant 0 : i32
    %c0_i32_0 = arith.constant 0 : i32
    %c0_i32_1 = arith.constant 0 : i32
    return %c0_i32, %c0_i32_0 : i32, i32
  }
  func.func @transform_16(%arg0: i32, %arg1: i32) -> (i32, i32, i32) {
    %c0_i32 = arith.constant 0 : i32
    %c0_i32_0 = arith.constant 0 : i32
    %c0_i32_1 = arith.constant 0 : i32
    return %arg0, %c0_i32, %c0_i32_0 : i32, i32, i32
  }
}

</mosaic_0001>

<bundles_post_ra>
// kernel: tpu_custom_call.1
= control target key start
LH: loop header
LB: loop body
LE: loop exit
PB: predicated region body
PF: predicated region fallthrough
CT: control target
= control target key end

     0   :  { %s4887_s0 = inlined_call_operand.vmem [shape: f32[2,8,32], index: 0, kind: input, shape index: {}]   ;;  %s4888_s1 = inlined_call_operand.vmem [shape: f32[2,8,8], index: 1, kind: input, shape index: {}]   ;;  %s4889_s2 = inlined_call_operand.vmem [shape: f32[2,1,32], index: 2, kind: input, shape index: {}]   ;;  %s4890_s3 = inlined_call_operand.vmem [shape: f32[2,1,32], index: 3, kind: input, shape index: {}]   ;;  %s4891_s4 = inlined_call_operand.vmem [shape: bf16[2,32,96], index: 4, kind: input, shape index: {}]   ;;  %s4892_s5 = inlined_call_operand.vmem [shape: f32[2,1,96], index: 5, kind: input, shape index: {}]   ;;  %s4893_s6 = inlined_call_operand.vmem [shape: bf16[2,32,32], index: 6, kind: input, shape index: {}]   ;;  %s4894_s7 = inlined_call_operand.vmem [shape: f32[2,1,32], index: 7, kind: input, shape index: {}]   ;;  %s4895_s8 = inlined_call_operand.vmem [shape: f32[2,1,32], index: 8, kind: input, shape index: {}]   ;;  %s4896_s9 = inlined_call_operand.vmem [shape: f32[2,1,32], index: 9, kind: input, shape index: {}]   ;;  %s4897_s10 = inlined_call_operand.vmem [shape: bf16[2,32,2048], index: 10, kind: input, shape index: {}]   ;;  %s4898_s11 = inlined_call_operand.vmem [shape: f32[2,1,2048], index: 11, kind: input, shape index: {}]   ;;  %s4899_s12 = inlined_call_operand.vmem [shape: bf16[2,2048,32], index: 12, kind: input, shape index: {}]   ;;  %s4900_s13 = inlined_call_operand.vmem [shape: f32[2,1,32], index: 13, kind: input, shape index: {}]   ;;  %s4901_s14 = inlined_call_operand.vmem [shape: f32[1,32], index: 14, kind: input, shape index: {}]   ;;  %s4902_s15 = inlined_call_operand.vmem [shape: f32[1,32], index: 15, kind: input, shape index: {}]   ;;  %s4903_s16 = inlined_call_operand.hbm [shape: f32[2,8,32], index: 16, kind: output, shape index: {}]  }
   0x1   :  { %4919 = sst [smem:[#allocation20_spill]] %s4887_s0 }
   0x2   :  { %4920 = sst [smem:[#allocation21_spill]] %s4888_s1 }
   0x3   :  { %4921 = sst [smem:[#allocation22_spill]] %s4891_s4 }
   0x4   :  { %4922 = sst [smem:[#allocation23_spill]] %s4893_s6 }
   0x5   :  { %4923 = sst [smem:[#allocation24_spill]] %s4896_s9 }
   0x6   :  { %4924 = sst [smem:[#allocation25_spill]] %s4899_s12 }
   0x7   :  { %4925 = sst [smem:[#allocation26_spill]] %s4901_s14 }
   0x8   :  { %4926 = sst [smem:[#allocation27_spill]] %s4902_s15 }
   0x9   :  { %4927 = sst [smem:[#allocation28_spill]] %s4903_s16 }
   0xa   :  { %21 = vsyncpa [#allocation4], 0 }
   0xb   :  { %23 = vsyncpa [#allocation4 + $0x1], 0  ;;  %s4318_s21 = smov 0   ;;  %s4320_s22 = smov 0  }
   0xc   :  { %s4322_s23 = smov 0   ;;  %s4324_s24 = smov 0  }
   0xd   :  { %s4326_s25 = smov 0   ;;  %s4328_s26 = smov 0  }
   0xe   :  { %s4330_s27 = smov 0   ;;  %s4332_s28 = smov 0  }
   0xf LB: > { %4928 = sst [smem:[#allocation6_spill]] %s4194_s21  ;;  %s3136_s29 = sadd.s32 4294967295, %s4222_s28   ;;  %s4222_s28 = sphi %s4332_s28, %s29_s28   ;;  %s4218_s27 = sphi %s4330_s27, %s4976_s27   ;;  %s4214_s26 = sphi %s4328_s26, %s4975_s26   ;;  %s4210_s25 = sphi %s4326_s25, %s4974_s25   ;;  %s4206_s24 = sphi %s4324_s24, %s4973_s24   ;;  %s4202_s23 = sphi %s4322_s23, %s4972_s23   ;;  %s4198_s22 = sphi %s4320_s22, %s4971_s22   ;;  %s4194_s21 = sphi %s4318_s21, %s4970_s21  }
  0x10   : > { %4929 = sst [smem:[#allocation7_spill]] %s4198_s22  ;;  %s3137_s30 = sadd.s32 4294967294, %s4222_s28  }
  0x11   : > { %4930 = sst [smem:[#allocation8_spill]] %s4202_s23  ;;  %s38_s0 = sadd.s32 1, %s4214_s26 }
  0x12   : > { %4931 = sst [smem:[#allocation9_spill]] %s4206_s24  ;;  %p39_p0 = scmp.ge.s32.totalorder %s38_s0, 2 }
  0x13   : > { %4932 = sst [smem:[#allocation10_spill]] %s4210_s25  ;;  %s41_s17 = sadd.s32 1, %s4218_s27 }
  0x14   : > { %4933 = sst [smem:[#allocation11_spill]] %s4214_s26  ;;  %p464_p1 = scmp.ne.s32.totalorder %s4202_s23, %s4198_s22 }
  0x15   : > { %4934 = sst [smem:[#allocation12_spill]] %s4218_s27  ;;  %p465_p2 = scmp.eq.s32.totalorder %s3136_s29, 3 }
  0x16   : > { %4935 = sst [smem:[#allocation13_spill]] %s4222_s28  ;;  %s4978_s0 = smov (%p39_p0, %s38_s0), 0 }
  0x17   : > { %4936 = sst [smem:[#allocation14_spill]] %s4978_s0  ;;  %s4980_s17 = smov (!%p39_p0, %s41_s17), %s4218_s27 }
  0x18   : > { %p4367_p3 = por %p465_p2, %p464_p1  ;;  %p470_p4 = scmp.ne.s32.totalorder %s4198_s22, %s4194_s21 }
  0x19   : > { %p43_p5 = scmp.ge.s32.totalorder %s4980_s17, 2  ;;  %p471_p6 = scmp.eq.s32.totalorder %s3137_s30, 3 }
  0x1a   : > { %s4937_s18 = scalar_select %p4367_p3, 1, 0 }
  0x1b   : > { %p3140_p7 = scmp.ge.s32.totalorder %s4222_s28, 1  ;;  %p590_p8 = scmp.lt.s32.totalorder %s4222_s28, 5 }
  0x1c   : > { %4938 = sst [smem:[#allocation15_spill]] %s4937_s18  ;;  %s4982_s17 = smov (%p43_p5, %s4980_s17), 0 }
  0x1d   : > { %4939 = sst [smem:[#allocation16_spill]] %s4982_s17  ;;  %p4377_p9 = por %p471_p6, %p470_p4 }
  0x1e   : > { %p591_p10 = pnand %p3140_p7, %p590_p8  ;;  %s451_s20 = ssub.s32 %s4218_s27, %s4982_s17 }
  0x1f   : > { %s4940_s19 = scalar_select %p4377_p9, 1, 0 }
  0x20   : > { %s454_s29 = sadd.s32 1, %s4202_s23  ;;  %p452_p11 = scmp.eq.s32.totalorder %s451_s20, 0 }
  0x21   : > { %4941 = sst [smem:[#allocation17_spill]] %s4940_s19  ;;  %594 = sbr.rel (%p591_p10) target bundleno = 2401 (0x961), region = 84 }
  0x22   : > { %s4385_s0 = scalar_select %p452_p11, %s4202_s23, %s454_s29  }
  0x24   : > { %4942 = sst [smem:[#allocation18_spill]] %s4385_s0 }
  0x26   : > { %s4909_s30 = sand.u32 1, %s4198_s22   ;;  %p688_p12 = scmp.lt.s32.totalorder %s4210_s25, 1 }
  0x27   : > { %s4391_s26 = sshll.u32 %s4909_s30, 3  ;;  %p696_p13 = scmp.lt.s32.totalorder %s4206_s24, 1 }
  0x28   : > { %s689_s19 = scalar_select %p688_p12, %s4210_s25, 1 }
  0x29   : > { %s4396_s21 = scalar_select %p696_p13, %s4206_s24, 1 }
  0x2a   : > { %s3142_s20 = sshll.u32 %s689_s19, 3  ;;  %s4943_s27 = sld [smem:[#allocation20_spill]] }
  0x2b   : > { %s4944_s1 = sld [smem:[#allocation21_spill]]  ;;  %s3841_s19 = sshll.u32 %s4396_s21, 4 }
  0x2c   : > { %s4946_s4 = sld [smem:[#allocation22_spill]]  ;;  %s3844_s22 = sshll.u32 %s4396_s21, 10 }
  0x2d   : > { %s4947_s6 = sld [smem:[#allocation23_spill]]  ;;  %s740_s14 = scalar_lea.vmem %s4900_s13, %s4396_s21 }
  0x2e   : > { %s4949_s12 = sld [smem:[#allocation25_spill]]  ;;  %s687_s17 = scalar_lea.vmem [#allocation3], %s4391_s26 }
  0x2f   : > { %s4950_s9 = sld [smem:[#allocation9_spill]] }
  0x30   : > { %s691_s30 = scalar_lea.vmem %s4943_s27, %s3142_s20  ;;  %s3843_s27 = sshll.u32 %s4396_s21, 8 }
  0x31   : > { %s4404_s28 = scalar_lea.vmem %s4944_s1, %s3142_s20 }
  0x32   : > { %4945 = sst [smem:[#allocation19_spill]] %s4404_s28  ;;  %s4422_s23 = scalar_lea.vmem %s4946_s4, %s3841_s19 }
  0x33   : > { %s4427_s16 = scalar_lea.vmem %s4947_s6, %s3841_s19  ;;  %s4445_s28 = scalar_lea.vmem %s4897_s10, %s3843_s27 }
  0x34   : > { %s4450_s6 = scalar_lea.vmem %s4898_s11, %s3841_s19  ;;  %s4460_s24 = scalar_lea.vmem %s4949_s12, %s3844_s22 }
  0x35   : > { %p3153_p0 = scmp.ne.s32.totalorder %s4950_s9, 0 }
  0x37   : > { %745 = sbr.rel (%p3153_p0) target bundleno = 62 (0x3e), region = 88 }
  0x3c   : > { %v746_v0 = vld [vmem:[%s691_s30] sm:$0xff]  ;;  %vm747_vm0 = vcmask 261120  }
  0x3d   : > { %748 = vst.msk [vmem:[#allocation2] sm:$0xff] %vm747_vm0, %v746_v0 }
  0x3e PF: > { %vm752_vm1 = vcmask 261120   ;;  %v4224_v3 = vmov 32.0   ;;  %v3846_v15 = vld [vmem:[%s4422_s23 + $0x8] sm:$0xff]  ;;  %v3845_v16 = vld [vmem:[%s4422_s23] sm:$0xff]  ;;  %s4951_s9 = scalar_lea.vmem %s4889_s2, %s4396_s21  ;;  %s4952_s23 = scalar_lea.vmem %s4890_s3, %s4396_s21  ;;  %vm850_vm5 = vcmask 64512   ;;  %vm995_vm6 = vcmask 1043456  }
  0x3f   : > { %4096 = vrcp.f32 %v4224_v3  ;;  %823 = vmatpush.bf16.msra.mxu0 %v3846_v15  ;;  %v4089_v30 = vld [vmem:[%s4951_s9] ss:$0 sm:$0xff]  ;;  %s4953_s29 = scalar_lea.vmem %s4892_s5, %s4396_s21  ;;  %s4225_s0 = smov 104   ;;  %vm1088_vm7 = vcmask 130048   ;;  %vm1090_vm8 = vcmask 195584  }
  0x40   : > { %v4090_v32 = vld [vmem:[%s4952_s23] ss:$0 sm:$0xff]  ;;  %s4226_s20 = smov 120   ;;  %s4227_s22 = smov 112  }
  0x41   : > { %v4091_v37 = vld [vmem:[%s4953_s29] ss:$0 sm:$0xff]  ;;  %s4228_s18 = smov 96   ;;  %s4954_s25 = sld [smem:[#allocation19_spill]] }
  0x42   : > { %s4229_s12 = smov 64   ;;  %s4230_s1 = smov 8  }
  0x43   : > { %824 = vmatpush.bf16.msra.mxu0 %v3845_v16  ;;  %s4231_s4 = smov 24   ;;  %s4232_s9 = smov 16  }
  0x44   : > { %v4464_v1 = vld [vmem:[#allocation2] sm:$0xff]  ;;  %s4955_s23 = scalar_lea.vmem %s4894_s7, %s4396_s21  ;;  %s4956_s27 = scalar_lea.vmem %s4895_s8, %s4396_s21 }
  0x45   : > { %v753_v2 = vsel %vm752_vm1, %v4464_v1, 0.0  ;;  %v4097_v4 = vpop.eup %4096 }
  0x46   : > { %754 = vadd.xlane.f32.xlu0 %v753_v2  ;;  %v757_v5 = vmul.f32 32.0, %v4097_v4  ;;  %vm761_vm2 = vweird.f32 %v4097_v4 }
  0x47   : > { %v844_v0 = vld [vmem:[%s4954_s25] sm:$0xff] }
  0x48   : > { %v758_v6 = vsub.f32 1.0, %v757_v5 }
  0x4a   : > { %v759_v7 = vmul.f32 %v4097_v4, %v758_v6 }
  0x4c   : > { %v760_v8 = vadd.f32 %v4097_v4, %v759_v7 }
  0x4e   : > { %v4468_v9 = vsel %vm761_vm2, %v4097_v4, %v760_v8 }
  0xb9   : > { %v755_v10 = vpop.xlane.xlu0 %754 }
  0xba   : > { %v763_v11 = vmul.f32 %v4468_v9, %v755_v10 }
  0xbc   : > { %v764_v12 = vsub.f32 %v4464_v1, %v763_v11 }
  0xbe   : > { %v765_v13 = vmul.f32 %v764_v12, %v764_v12  ;;  %v787_v31 = vmul.f32 %v4089_v30, %v764_v12 }
  0xc0   : > { %v766_v14 = vsel %vm752_vm1, %v765_v13, 0.0 }
  0xc1   : > { %767 = vadd.xlane.f32.xlu0 %v766_v14 }
 0x134   : > { %v768_v17 = vpop.xlane.xlu0 %767 }
 0x135   : > { %v769_v18 = vmul.f32 0.032258064, %v768_v17 }
 0x137   : > { %4098 = vrsqrt.f32 %v769_v18  ;;  %vm777_vm3 = vcmp.eq.f32.partialorder %v769_v18, inf  ;;  %v780_v26 = vand.u32 2147483648, %v769_v18  ;;  %vm779_vm4 = vcmp.eq.f32.partialorder %v769_v18, 0.0 }
 0x13d   : > { %v4099_v19 = vpop.eup %4098 }
 0x13e   : > { %v771_v20 = vmul.f32 %v4099_v19, %v769_v18 }
 0x140   : > { %v772_v21 = vmul.f32 %v4099_v19, %v771_v20 }
 0x142   : > { %v773_v22 = vmul.f32 0.5, %v772_v21 }
 0x144   : > { %v774_v23 = vsub.f32 1.5, %v773_v22 }
 0x146   : > { %v775_v24 = vmul.f32 %v4099_v19, %v774_v23 }
 0x148   : > { %v776_v25 = vmul.f32 %v775_v24, %v769_v18 }
 0x14a   : > { %v778_v27 = vsel %vm777_vm3, %v769_v18, %v776_v25 }
 0x14b   : > { %v781_v28 = vsel %vm779_vm4, %v780_v26, %v778_v27 }
 0x14c   : > { %v782_v29 = vadd.f32 1e-06, %v781_v28 }
 0x14e   : > { %4100 = vrcp.f32 %v782_v29 }
 0x154   : > { %v4101_v33 = vpop.eup %4100 }
 0x155   : > { %v788_v34 = vmul.f32 %v4101_v33, %v787_v31 }
 0x157   : > { %v792_v35 = vadd.f32 %v4090_v32, %v788_v34 }
 0x159   : > { %v793_v36 = vpack.c.bf16 %v792_v35, %v792_v35 }
 0x15b   : > { %3162 = vmatmul.msk.bf16.vlgmr.msra.gmra.mxu0 %vm752_vm1, %v793_v36 }
 0x1d8   : > { %v826_v38 = vpop.f32.mrf.mxu0 }
 0x1d9   : > { %v827_v39 = vadd.f32 %v4091_v37, %v826_v38 }
 0x1db   : > { %837 = vrot.lane.b32.xlu2 %v827_v39, %s4225_s0  ;;  %831 = vrot.lane.b32.xlu1 %v827_v39, %s4226_s20  ;;  %v840_v49 = vpack.c.bf16 %v827_v39, %v827_v39  ;;  %s4957_s20 = sld [smem:[#allocation24_spill]] }
 0x1dd   : > { %v846_v52 = vunpack.c.l.b16 %v840_v49 }
 0x1df   : > { %v4496_v55 = vpack.c.b16 %v846_v52, %v846_v52 }
 0x1e0   : > { %v828_v40 = vpop.f32.mrf.mxu0 }
 0x1e3   : > { %834 = vrot.lane.b32.xlu1 %v827_v39, %s4227_s22  ;;  %s4958_s22 = scalar_lea.vmem %s4957_s20, %s4396_s21  ;;  %s4959_s21 = sld [smem:[#allocation9_spill]] }
 0x1e9   : > { %p3836_p1 = scmp.ne.s32.totalorder %s4959_s21, 1 }
 0x235   : > { %v838_v41 = vpop.permute.xlu2 %837 }
 0x236   : > { %v843_v42 = vpack.c.bf16 %v838_v41, %v838_v41 }
 0x238   : > { %v919_v43 = vunpack.c.l.b16 %v843_v42 }
 0x23a   : > { %v4491_v44 = vpack.c.b16 %v919_v43, %v919_v43 }
 0x23c   : > { %921 = vrot.lane.b32.xlu1 %v4491_v44, %s4228_s18 }
 0x24d   : > { %v832_v45 = vpop.permute.xlu1 %831 }
 0x24e   : > { %v841_v46 = vpack.c.bf16 %v832_v45, %v832_v45 }
 0x250   : > { %v871_v47 = vunpack.c.l.b16 %v841_v46 }
 0x252   : > { %v872_v48 = vpack.c.b16 %v871_v47, %v871_v47 }
 0x254   : > { %873 = vrot.lane.b32.xlu2 %v872_v48, %s4228_s18 }
 0x255   : > { %v835_v50 = vpop.permute.xlu1 %834 }
 0x256   : > { %v842_v51 = vpack.c.bf16 %v835_v50, %v835_v50 }
 0x258   : > { %v895_v53 = vunpack.c.l.b16 %v842_v51 }
 0x25a   : > { %v4494_v54 = vpack.c.b16 %v895_v53, %v895_v53 }
 0x25c   : > { %897 = vrot.lane.b32.xlu0 %v4494_v54, %s4228_s18  ;;  %848 = vrot.lane.b32.xlu2 %v4496_v55, %s4228_s18  ;;  %s4960_s18 = sld [smem:[#allocation26_spill]] (!%p3836_p1) }
 0x2ae   : > { %v874_v56 = vpop.permute.xlu2 %873  ;;  %v922_v57 = vpop.permute.xlu1 %921 }
 0x2af   : > { %v879_v58 = vsel %vm850_vm5, %v874_v56, 0  ;;  %v927_v59 = vsel %vm850_vm5, %v922_v57, 0 }
 0x2b0   : > { %888 = vmatpush.bf16.xpose.msra.mxu2 %v879_v58  ;;  %936 = vmatpush.bf16.xpose.msrb.mxu0 %v927_v59 }
 0x2b6   : > { %v849_v60 = vpop.permute.xlu2 %848 }
 0x2b7   : > { %3164 = vmatmul.msk.bf16.vlgmr.msra.gmra.mxu2 %vm850_vm5, %v841_v46  ;;  %3166 = vmatmul.msk.bf16.vlgmr.msrb.gmra.mxu0 %vm850_vm5, %v843_v42  ;;  %v855_v61 = vsel %vm850_vm5, %v849_v60, 0 }
 0x2b8   : > { %864 = vmatpush.bf16.xpose.msra.mxu1 %v855_v61 }
 0x2bf   : > { %3163 = vmatmul.msk.bf16.vlgmr.msra.gmra.mxu1 %vm850_vm5, %v840_v49 }
 0x2ce   : > { %v898_v62 = vpop.permute.xlu0 %897 }
 0x2cf   : > { %v903_v63 = vsel %vm850_vm5, %v898_v62, 0 }
 0x2d0   : > { %912 = vmatpush.bf16.xpose.msra.mxu3 %v903_v63 }
 0x2d7   : > { %3165 = vmatmul.msk.bf16.vlgmr.msra.gmra.mxu3 %vm850_vm5, %v842_v51 }
 0x334   : > { %v938_v2 = vpop.f32.mrf.mxu0 }
 0x335   : > { %v939_v3 = vadd.f32 %v938_v2, %v844_v0 }
 0x337   : > { %v951_v4 = vsel %vm850_vm5, %v939_v3, -inf }
 0x338   : > { %952 = vmax.xlane.f32.xlu0 %v951_v4 }
 0x33a   : > { %v890_v5 = vpop.f32.mrf.mxu2 }
 0x33b   : > { %v891_v6 = vadd.f32 %v890_v5, %v844_v0 }
 0x33c   : > { %v866_v7 = vpop.f32.mrf.mxu1  ;;  %v940_v8 = vpop.f32.mrf.mxu0 }
 0x33d   : > { %v945_v10 = vsel %vm850_vm5, %v891_v6, -inf  ;;  %v867_v16 = vadd.f32 %v866_v7, %v844_v0  ;;  %v3848_v8 = vld [vmem:[%s4427_s16 + $0x8] sm:$0xff] }
 0x33e   : > { %946 = vmax.xlane.f32.xlu1 %v945_v10  ;;  %v3847_v10 = vld [vmem:[%s4427_s16] sm:$0xff] }
 0x33f   : > { %v942_v18 = vsel %vm850_vm5, %v867_v16, -inf }
 0x342   : > { %v892_v11 = vpop.f32.mrf.mxu2 }
 0x344   : > { %v868_v12 = vpop.f32.mrf.mxu1 }
 0x34c   : > { %1012 = vrot.lane.b32.xlu0 %v872_v48, %s4229_s12 }
 0x35a   : > { %v914_v13 = vpop.f32.mrf.mxu3 }
 0x35b   : > { %v915_v14 = vadd.f32 %v914_v13, %v844_v0 }
 0x35d   : > { %v948_v15 = vsel %vm850_vm5, %v915_v14, -inf }
 0x35e   : > { %949 = vmax.xlane.f32.xlu2 %v948_v15 }
 0x362   : > { %v916_v17 = vpop.f32.mrf.mxu3 }
 0x366   : > { %943 = vmax.xlane.f32.xlu2 %v942_v18  ;;  %v4092_v18 = vld [vmem:[%s4955_s23] ss:$0 sm:$0xff] }
 0x3ab   : > { %v953_v19 = vpop.xlane.xlu0 %952 }
 0x3ac   : > { %v957_v20 = vsub.f32 %v939_v3, %v953_v19 }
 0x3ae   : > { %v964_v21 = vmul.f32 1.442695, %v957_v20 }
 0x3b0   : > { %4102 = vpow2.f32 %v964_v21 }
 0x3b1   : > { %v947_v22 = vpop.xlane.xlu1 %946 }
 0x3b2   : > { %v955_v23 = vsub.f32 %v891_v6, %v947_v22 }
 0x3b4   : > { %v960_v24 = vmul.f32 1.442695, %v955_v23 }
 0x3b6   : > { %v4103_v25 = vpop.eup %4102  ;;  %4104 = vpow2.f32 %v960_v24 }
 0x3b7   : > { %v975_v26 = vsel %vm850_vm5, %v4103_v25, 0.0 }
 0x3b8   : > { %976 = vadd.xlane.f32.xlu1 %v975_v26 }
 0x3bc   : > { %v4105_v27 = vpop.eup %4104 }
 0x3bd   : > { %v969_v30 = vsel %vm850_vm5, %v4105_v27, 0.0 }
 0x3be   : > { %v1013_v28 = vpop.permute.xlu0 %1012 }
 0x3bf   : > { %v1018_v29 = vsel %vm995_vm6, %v1013_v28, 0  ;;  %v3246_v28 = vld [vmem:[%s4445_s28 + $0x80] sm:$0xf] }
 0x3c0   : > { %1027 = vmatpush.bf16.msrb.mxu2 %v1018_v29  ;;  %970 = vadd.xlane.f32.xlu1 %v969_v30  ;;  %v3873_v29 = vld [vmem:[%s4445_s28 + $0xbc] sm:$0xf0]  ;;  %v3865_v30 = vld [vmem:[%s4445_s28 + $0x84] sm:$0xf] }
 0x3d1   : > { %v950_v31 = vpop.xlane.xlu2 %949 }
 0x3d2   : > { %v956_v32 = vsub.f32 %v915_v14, %v950_v31  ;;  %v3247_v31 = vor.u32 %v3873_v29, %v3246_v28  ;;  %v4093_v28 = vld [vmem:[%s4956_s27] ss:$0 sm:$0xff] }
 0x3d4   : > { %v962_v33 = vmul.f32 1.442695, %v956_v32  ;;  %v3248_v32 = vld [vmem:[%s4445_s28 + $0xc0] sm:$0xf0]  ;;  %1403 = vmatpush.bf16.msra.mxu2 %v3247_v31 }
 0x3d6   : > { %4106 = vpow2.f32 %v962_v33  ;;  %v3254_v33 = vld [vmem:[%s4445_s28 + $0x88] sm:$0xf] }
 0x3d9   : > { %1054 = vrot.lane.b32.xlu1 %v4491_v44, %s4229_s12  ;;  %v944_v34 = vpop.xlane.xlu2 %943 }
 0x3da   : > { %v954_v35 = vsub.f32 %v867_v16, %v944_v34  ;;  %v3874_v34 = vld [vmem:[%s4445_s28 + $0xc4] sm:$0xf0] }
 0x3dc   : > { %v4107_v36 = vpop.eup %4106  ;;  %v958_v37 = vmul.f32 1.442695, %v954_v35  ;;  %v3251_v35 = vor.u32 %v3865_v30, %v3248_v32  ;;  %v4094_v30 = vld [vmem:[%s4958_s22] ss:$0 sm:$0xff] }
 0x3dd   : > { %v972_v38 = vsel %vm850_vm5, %v4107_v36, 0.0 }
 0x3de   : > { %4108 = vpow2.f32 %v958_v37  ;;  %973 = vadd.xlane.f32.xlu2 %v972_v38  ;;  %v3866_v37 = vld [vmem:[%s4445_s28 + $0x8c] sm:$0xf] }
 0x3df   : > { %v3256_v38 = vld [vmem:[%s4445_s28 + $0xc8] sm:$0xf0] }
 0x3e4   : > { %v4109_v39 = vpop.eup %4108 }
 0x3e5   : > { %v966_v40 = vsel %vm850_vm5, %v4109_v39, 0.0 }
 0x3e6   : > { %967 = vadd.xlane.f32.xlu0 %v966_v40  ;;  %v3259_v40 = vor.u32 %v3866_v37, %v3256_v38  ;;  %v3286_v37 = vld [vmem:[%s4445_s28 + $0xa8] sm:$0xf] }
 0x3f6   : > { %1033 = vrot.lane.b32.xlu2 %v4494_v54, %s4229_s12 }
 0x3fe   : > { %990 = vrot.lane.b32.xlu2 %v4496_v55, %s4229_s12 }
 0x42b   : > { %v977_v41 = vpop.xlane.xlu1 %976 }
 0x433   : > { %v971_v42 = vpop.xlane.xlu1 %970 }
 0x434   : > { %4110 = vrcp.f32 %v971_v42  ;;  %v3182_v42 = vld [vmem:[%s4445_s28] sm:$0xf] }
 0x435   : > { %4112 = vrcp.f32 %v977_v41 }
 0x43a   : > { %v4111_v43 = vpop.eup %4110 }
 0x43b   : > { %v983_v44 = vmul.f32 %v4111_v43, %v4105_v27  ;;  %v4113_v46 = vpop.eup %4112  ;;  %v3857_v43 = vld [vmem:[%s4445_s28 + $0x3c] sm:$0xf0] }
 0x43c   : > { %v985_v47 = vmul.f32 %v4113_v46, %v4103_v25  ;;  %v3184_v46 = vld [vmem:[%s4445_s28 + $0x40] sm:$0xf0] }
 0x43d   : > { %v987_v45 = vpack.c.bf16 %v983_v44, %v983_v44  ;;  %v3183_v44 = vor.u32 %v3857_v43, %v3182_v42 }
 0x43e   : > { %v989_v50 = vpack.c.bf16 %v985_v47, %v985_v47  ;;  %v3190_v47 = vld [vmem:[%s4445_s28 + $0x8] sm:$0xf] }
 0x43f   : > { %3168 = vmatmul.msk.bf16.vlgmr.msrb.gmra.mxu2 %vm850_vm5, %v987_v45  ;;  %v3849_v45 = vld [vmem:[%s4445_s28 + $0x4] sm:$0xf] }
 0x440   : > { %1404 = vmatpush.bf16.msra.mxu2 %v3183_v44  ;;  %v3214_v44 = vld [vmem:[%s4445_s28 + $0x20] sm:$0xf] }
 0x44b   : > { %v1055_v48 = vpop.permute.xlu1 %1054 }
 0x44c   : > { %v1060_v49 = vsel %vm995_vm6, %v1055_v48, 0  ;;  %v3858_v48 = vld [vmem:[%s4445_s28 + $0x44] sm:$0xf0] }
 0x44d   : > { %1069 = vmatpush.bf16.msra.mxu0 %v1060_v49  ;;  %v3187_v49 = vor.u32 %v3849_v45, %v3184_v46  ;;  %v3861_v45 = vld [vmem:[%s4445_s28 + $0x5c] sm:$0xf0] }
 0x450   : > { %3170 = vmatmul.msk.bf16.vlgmr.msra.gmra.mxu0 %vm850_vm5, %v989_v50  ;;  %v3191_v50 = vor.u32 %v3858_v48, %v3190_v47  ;;  %v3853_v48 = vld [vmem:[%s4445_s28 + $0x24] sm:$0xf] }
 0x451   : > { %v974_v51 = vpop.xlane.xlu2 %973 }
 0x452   : > { %4114 = vrcp.f32 %v974_v51  ;;  %v3850_v51 = vld [vmem:[%s4445_s28 + $0xc] sm:$0xf] }
 0x458   : > { %v4115_v52 = vpop.eup %4114 }
 0x459   : > { %v984_v53 = vmul.f32 %v4115_v52, %v4107_v36  ;;  %v968_v54 = vpop.xlane.xlu0 %967  ;;  %v1034_v55 = vpop.permute.xlu2 %1033  ;;  %v3255_v36 = vor.u32 %v3874_v34, %v3254_v33  ;;  %v3192_v52 = vld [vmem:[%s4445_s28 + $0x48] sm:$0xf0]  ;;  %v3278_v33 = vld [vmem:[%s4445_s28 + $0xa0] sm:$0xf] }
 0x45a   : > { %4116 = vrcp.f32 %v968_v54  ;;  %v1039_v56 = vsel %vm995_vm6, %v1034_v55, 0  ;;  %v3262_v54 = vld [vmem:[%s4445_s28 + $0x90] sm:$0xf]  ;;  %v3877_v34 = vld [vmem:[%s4445_s28 + $0xdc] sm:$0xf0] }
 0x45b   : > { %1048 = vmatpush.bf16.msrb.mxu3 %v1039_v56  ;;  %v988_v57 = vpack.c.bf16 %v984_v53, %v984_v53  ;;  %1429 = vmatpush.bf16.msrb.mxu0 %v3255_v36  ;;  %v3195_v53 = vor.u32 %v3850_v51, %v3192_v52  ;;  %v3875_v55 = vld [vmem:[%s4445_s28 + $0xcc] sm:$0xf0]  ;;  %v3867_v56 = vld [vmem:[%s4445_s28 + $0x94] sm:$0xf]  ;;  %v3280_v36 = vld [vmem:[%s4445_s28 + $0xe0] sm:$0xf0]  ;;  %v3279_v42 = vor.u32 %v3877_v34, %v3278_v33 }
 0x45c   : > { %v3862_v51 = vld [vmem:[%s4445_s28 + $0x64] sm:$0xf0]  ;;  %v3854_v52 = vld [vmem:[%s4445_s28 + $0x2c] sm:$0xf]  ;;  %v3901_v33 = vld [vmem:[%s4460_s24 + $0xa0] sm:$0xff] }
 0x45d   : > { %v3909_v34 = vld [vmem:[%s4460_s24 + $0xe0] sm:$0xff] }
 0x45e   : > { %3169 = vmatmul.msk.bf16.vlgmr.msrb.gmra.mxu3 %vm850_vm5, %v988_v57 }
 0x45f   : > { %1416 = vmatpush.bf16.msra.mxu3 %v3251_v35  ;;  %1430 = vmatpush.bf16.msrb.mxu0 %v3191_v50  ;;  %v3869_v35 = vld [vmem:[%s4445_s28 + $0xa4] sm:$0xf]  ;;  %v3222_v50 = vld [vmem:[%s4445_s28 + $0x28] sm:$0xf] }
 0x460   : > { %v4117_v58 = vpop.eup %4116  ;;  %v3283_v43 = vor.u32 %v3869_v35, %v3280_v36  ;;  %v3885_v35 = vld [vmem:[%s4460_s24 + $0x20] sm:$0xff] }
 0x461   : > { %v982_v59 = vmul.f32 %v4117_v58, %v4109_v39  ;;  %v991_v60 = vpop.permute.xlu2 %990  ;;  %v3263_v58 = vor.u32 %v3875_v55, %v3262_v54  ;;  %v3215_v54 = vor.u32 %v3861_v45, %v3214_v44  ;;  %v3893_v36 = vld [vmem:[%s4460_s24 + $0x60] sm:$0xff]  ;;  %v3891_v44 = vld [vmem:[%s4460_s24 + $0x50] sm:$0xff]  ;;  %v3898_v45 = vld [vmem:[%s4460_s24 + $0x88] sm:$0xff] }
 0x462   : > { %v997_v61 = vsel %vm995_vm6, %v991_v60, 0  ;;  %v3270_v60 = vld [vmem:[%s4445_s28 + $0x98] sm:$0xf] }
 0x463   : > { %v986_v62 = vpack.c.bf16 %v982_v59, %v982_v59  ;;  %1006 = vmatpush.bf16.msrb.mxu1 %v997_v61  ;;  %1417 = vmatpush.bf16.msra.mxu3 %v3187_v49  ;;  %v3264_v59 = vld [vmem:[%s4445_s28 + $0xd0] sm:$0xf0]  ;;  %v3876_v61 = vld [vmem:[%s4445_s28 + $0xd4] sm:$0xf0]  ;;  %v3216_v49 = vld [vmem:[%s4445_s28 + $0x60] sm:$0xf0] }
 0x464   : > { %1455 = vmatpush.bf16.msrb.mxu2 %v3263_v58  ;;  %v3219_v55 = vor.u32 %v3853_v48, %v3216_v49  ;;  %v3294_v58 = vld [vmem:[%s4445_s28 + $0xb0] sm:$0xf]  ;;  %v3897_v48 = vld [vmem:[%s4460_s24 + $0x80] sm:$0xff] }
 0x465   : > { %v3905_v49 = vld [vmem:[%s4460_s24 + $0xc0] sm:$0xff] }
 0x466   : > { %3167 = vmatmul.msk.bf16.vlgmr.msrb.gmra.mxu1 %vm850_vm5, %v986_v62 }
 0x467   : > { %1122 = vmatpush.bf16.msra.mxu1 %v3848_v8  ;;  %v3200_v8 = vld [vmem:[%s4445_s28 + $0x50] sm:$0xf0] }
 0x46b   : > { %1123 = vmatpush.bf16.msra.mxu1 %v3847_v10 }
 0x46f   : > { %1442 = vmatpush.bf16.msrb.mxu1 %v3259_v40  ;;  %v3288_v40 = vld [vmem:[%s4445_s28 + $0xe8] sm:$0xf0] }
 0x473   : > { %1443 = vmatpush.bf16.msrb.mxu1 %v3195_v53  ;;  %v3224_v53 = vld [vmem:[%s4445_s28 + $0x68] sm:$0xf0] }
 0x4c2   : > { %v1029_v63 = vpop.f32.mrf.mxu2 }
 0x4c3   : > { %1076 = vrot.lane.b32.xlu1 %v1029_v63, %s4230_s1  ;;  %v3267_v63 = vor.u32 %v3867_v56, %v3264_v59  ;;  %v3223_v56 = vor.u32 %v3862_v51, %v3222_v50  ;;  %v3879_v59 = vld [vmem:[%s4445_s28 + $0xec] sm:$0xf0]  ;;  %v3936_v50 = vld [vmem:[%s4460_s24 + $0x1b8] sm:$0xff]  ;;  %s4961_s1 = sld [smem:[#allocation27_spill]] (!%p3836_p1) }
 0x4c4   : > { %v3944_v51 = vld [vmem:[%s4460_s24 + $0x1f8] sm:$0xff] }
 0x4c5   : > { %1468 = vmatpush.bf16.msrb.mxu3 %v3267_v63  ;;  %v3880_v63 = vld [vmem:[%s4445_s28 + $0xf4] sm:$0xf0] }
 0x4ca   : > { %v1031_v0 = vpop.f32.mrf.mxu2 }
 0x4cb   : > { %v3271_v0 = vor.u32 %v3876_v61, %v3270_v60  ;;  %v3871_v60 = vld [vmem:[%s4445_s28 + $0xb4] sm:$0xf] }
 0x4cc   : > { %v3296_v61 = vld [vmem:[%s4445_s28 + $0xf0] sm:$0xf0] }
 0x4cd   : > { %v1071_v2 = vpop.f32.mrf.mxu0  ;;  %1481 = vmatpush.bf16.msra.mxu0 %v3271_v0  ;;  %v3872_v0 = vld [vmem:[%s4445_s28 + $0xbc] sm:$0xf] }
 0x4ce   : > { %1084 = vrot.lane.b32.xlu1 %v1071_v2, %s4231_s4  ;;  %v3868_v2 = vld [vmem:[%s4445_s28 + $0x9c] sm:$0xf] }
 0x4d5   : > { %v1073_v3 = vpop.f32.mrf.mxu0 }
 0x4d6   : > { %v3272_v3 = vld [vmem:[%s4445_s28 + $0xd8] sm:$0xf0] }
 0x4e1   : > { %v1050_v4 = vpop.f32.mrf.mxu3 }
 0x4e2   : > { %1080 = vrot.lane.b32.xlu2 %v1050_v4, %s4232_s9  ;;  %v3198_v4 = vld [vmem:[%s4445_s28 + $0x10] sm:$0xf] }
 0x4e3   : > { %v1008_v5 = vpop.f32.mrf.mxu1 }
 0x4e9   : > { %v1052_v6 = vpop.f32.mrf.mxu3 }
 0x4ea   : > { %v3859_v6 = vld [vmem:[%s4445_s28 + $0x4c] sm:$0xf0] }
 0x4eb   : > { %v1010_v7 = vpop.f32.mrf.mxu1 }
 0x4ec   : > { %v3851_v7 = vld [vmem:[%s4445_s28 + $0x14] sm:$0xf] }
 0x535   : > { %v1077_v11 = vpop.permute.xlu1 %1076 }
 0x536   : > { %v1087_v13 = vsel %vm850_vm5, %v1008_v5, %v1077_v11  ;;  %v3275_v5 = vor.u32 %v3868_v2, %v3272_v3  ;;  %v3199_v11 = vor.u32 %v3859_v6, %v3198_v4  ;;  %v3304_v2 = vld [vmem:[%s4445_s28 + $0xf8] sm:$0xf0]  ;;  %v3295_v3 = vor.u32 %v3879_v59, %v3294_v58  ;;  %v3863_v6 = vld [vmem:[%s4445_s28 + $0x6c] sm:$0xf0] }
 0x537   : > { %v3299_v4 = vor.u32 %v3871_v60, %v3296_v61  ;;  %v3919_v58 = vld [vmem:[%s4460_s24 + $0x130] sm:$0xff]  ;;  %v3934_v60 = vld [vmem:[%s4460_s24 + $0x1a8] sm:$0xff] }
 0x538   : > { %1456 = vmatpush.bf16.msrb.mxu2 %v3199_v11  ;;  %v3232_v11 = vld [vmem:[%s4445_s28 + $0x70] sm:$0xf0]  ;;  %v3942_v61 = vld [vmem:[%s4460_s24 + $0x1e8] sm:$0xff] }
 0x539   : > { %v3927_v59 = vld [vmem:[%s4460_s24 + $0x170] sm:$0xff] }
 0x53c   : > { %v1081_v12 = vpop.permute.xlu2 %1080 }
 0x53d   : > { %v1089_v14 = vsel %vm1088_vm7, %v1087_v13, %v1081_v12  ;;  %v3203_v12 = vor.u32 %v3851_v7, %v3200_v8  ;;  %v3206_v13 = vld [vmem:[%s4445_s28 + $0x18] sm:$0xf]  ;;  %v3307_v8 = vor.u32 %v3872_v0, %v3304_v2  ;;  %v3933_v0 = vld [vmem:[%s4460_s24 + $0x1a0] sm:$0xff] }
 0x53e   : > { %v3941_v2 = vld [vmem:[%s4460_s24 + $0x1e0] sm:$0xff] }
 0x53f   : > { %1469 = vmatpush.bf16.msrb.mxu3 %v3203_v12  ;;  %v3238_v12 = vld [vmem:[%s4445_s28 + $0x38] sm:$0xf] }
 0x540   : > { %v1085_v15 = vpop.permute.xlu1 %1084 }
 0x541   : > { %v1091_v16 = vsel %vm1090_vm8, %v1089_v14, %v1085_v15  ;;  %v3860_v14 = vld [vmem:[%s4445_s28 + $0x54] sm:$0xf0]  ;;  %v3852_v15 = vld [vmem:[%s4445_s28 + $0x1c] sm:$0xf] }
 0x542   : > { %v1092_v17 = vpack.c.bf16 %v1091_v16, %v1091_v16  ;;  %v3207_v16 = vor.u32 %v3860_v14, %v3206_v13  ;;  %v3864_v13 = vld [vmem:[%s4445_s28 + $0x74] sm:$0xf0]  ;;  %v3856_v14 = vld [vmem:[%s4445_s28 + $0x3c] sm:$0xf] }
 0x544   : > { %3179 = vmatmul.msk.bf16.vlgmr.msra.gmra.mxu1 %vm752_vm1, %v1092_v17  ;;  %v3208_v17 = vld [vmem:[%s4445_s28 + $0x58] sm:$0xf0]  ;;  %1482 = vmatpush.bf16.msra.mxu0 %v3207_v16 }
 0x545   : > { %1494 = vmatpush.bf16.msra.mxu1 %v3275_v5  ;;  %v3230_v5 = vld [vmem:[%s4445_s28 + $0x30] sm:$0xf] }
 0x546   : > { %v3231_v16 = vor.u32 %v3863_v6, %v3230_v5  ;;  %v3932_v5 = vld [vmem:[%s4460_s24 + $0x198] sm:$0xff] }
 0x547   : > { %v3940_v6 = vld [vmem:[%s4460_s24 + $0x1d8] sm:$0xff] }
 0x5c1   : > { %v1125_v19 = vpop.f32.mrf.mxu1 }
 0x5c2   : > { %v1126_v20 = vadd.f32 %v4092_v18, %v1125_v19  ;;  %v3211_v19 = vor.u32 %v3852_v15, %v3208_v17  ;;  %v3240_v15 = vld [vmem:[%s4445_s28 + $0x78] sm:$0xf0] }
 0x5c4   : > { %v4542_v21 = vadd.f32 %v1126_v20, %v4464_v1  ;;  %1495 = vmatpush.bf16.msra.mxu1 %v3211_v19  ;;  %v3243_v19 = vor.u32 %v3856_v14, %v3240_v15  ;;  %v3915_v14 = vld [vmem:[%s4460_s24 + $0x110] sm:$0xff] }
 0x5c5   : > { %v3923_v15 = vld [vmem:[%s4460_s24 + $0x150] sm:$0xff] }
 0x5c6   : > { %v1132_v22 = vsel %vm752_vm1, %v4542_v21, 0.0 }
 0x5c7   : > { %1133 = vadd.xlane.f32.xlu2 %v1132_v22 }
 0x5c9   : > { %v1127_v23 = vpop.f32.mrf.mxu1 }
 0x63a   : > { %v1134_v24 = vpop.xlane.xlu2 %1133 }
 0x63b   : > { %v1135_v25 = vmul.f32 %v1134_v24, %v4468_v9 }
 0x63d   : > { %v4548_v26 = vsub.f32 %v4542_v21, %v1135_v25 }
 0x63f   : > { %v1137_v27 = vmul.f32 %v4548_v26, %v4548_v26  ;;  %v1159_v29 = vmul.f32 %v4093_v28, %v4548_v26  ;;  %v3878_v26 = vld [vmem:[%s4445_s28 + $0xe4] sm:$0xf0]  ;;  %v3895_v28 = vld [vmem:[%s4460_s24 + $0x70] sm:$0xff] }
 0x640   : > { %v3287_v46 = vor.u32 %v3878_v26, %v3286_v37  ;;  %v3900_v37 = vld [vmem:[%s4460_s24 + $0x98] sm:$0xff] }
 0x641   : > { %v1138_v1 = vsel %vm752_vm1, %v1137_v27, 0.0  ;;  %v3884_v26 = vld [vmem:[%s4460_s24 + $0x18] sm:$0xff] }
 0x642   : > { %1139 = vadd.xlane.f32.xlu1 %v1138_v1 }
 0x6b5   : > { %v1140_v39 = vpop.xlane.xlu1 %1139 }
 0x6b6   : > { %v4561_v41 = vmul.f32 0.032258064, %v1140_v39  ;;  %v3870_v39 = vld [vmem:[%s4445_s28 + $0xac] sm:$0xf] }
 0x6b7   : > { %v3291_v47 = vor.u32 %v3870_v39, %v3288_v40  ;;  %v3892_v39 = vld [vmem:[%s4460_s24 + $0x58] sm:$0xff]  ;;  %v3899_v40 = vld [vmem:[%s4460_s24 + $0x90] sm:$0xff] }
 0x6b8   : > { %4118 = vrsqrt.f32 %v4561_v41  ;;  %vm1149_vm9 = vcmp.eq.f32.partialorder %v4561_v41, inf  ;;  %v1152_v24 = vand.u32 2147483648, %v4561_v41  ;;  %vm1151_vm10 = vcmp.eq.f32.partialorder %v4561_v41, 0.0 }
 0x6be   : > { %v4119_v57 = vpop.eup %4118 }
 0x6bf   : > { %v1143_v62 = vmul.f32 %v4119_v57, %v4561_v41 }
 0x6c1   : > { %v1144_v10 = vmul.f32 %v4119_v57, %v1143_v62  ;;  %v3302_v62 = vld [vmem:[%s4445_s28 + $0xb8] sm:$0xf] }
 0x6c2   : > { %v3303_v7 = vor.u32 %v3880_v63, %v3302_v62  ;;  %v3918_v62 = vld [vmem:[%s4460_s24 + $0x128] sm:$0xff] }
 0x6c3   : > { %v1145_v18 = vmul.f32 0.5, %v1144_v10  ;;  %v3855_v10 = vld [vmem:[%s4445_s28 + $0x34] sm:$0xf]  ;;  %v3926_v63 = vld [vmem:[%s4460_s24 + $0x168] sm:$0xff] }
 0x6c4   : > { %v3235_v17 = vor.u32 %v3855_v10, %v3232_v11  ;;  %v3916_v10 = vld [vmem:[%s4460_s24 + $0x118] sm:$0xff] }
 0x6c5   : > { %v1146_v20 = vsub.f32 1.5, %v1145_v18  ;;  %v3239_v18 = vor.u32 %v3864_v13, %v3238_v12  ;;  %v3924_v11 = vld [vmem:[%s4460_s24 + $0x158] sm:$0xff]  ;;  %v3930_v12 = vld [vmem:[%s4460_s24 + $0x188] sm:$0xff] }
 0x6c6   : > { %v3938_v13 = vld [vmem:[%s4460_s24 + $0x1c8] sm:$0xff] }
 0x6c7   : > { %v1147_v22 = vmul.f32 %v4119_v57, %v1146_v20  ;;  %v3227_v57 = vor.u32 %v3854_v52, %v3224_v53  ;;  %v3904_v20 = vld [vmem:[%s4460_s24 + $0xb8] sm:$0xff]  ;;  %v3881_v52 = vld [vmem:[%s4460_s24] sm:$0xff] }
 0x6c8   : > { %v3889_v53 = vld [vmem:[%s4460_s24 + $0x40] sm:$0xff] }
 0x6c9   : > { %v1148_v23 = vmul.f32 %v1147_v22, %v4561_v41  ;;  %v3912_v22 = vld [vmem:[%s4460_s24 + $0xf8] sm:$0xff] }
 0x6cb   : > { %v1150_v25 = vsel %vm1149_vm9, %v4561_v41, %v1148_v23  ;;  %v3888_v23 = vld [vmem:[%s4460_s24 + $0x38] sm:$0xff] }
 0x6cc   : > { %v1153_v27 = vsel %vm1151_vm10, %v1152_v24, %v1150_v25  ;;  %v3896_v24 = vld [vmem:[%s4460_s24 + $0x78] sm:$0xff]  ;;  %v3903_v25 = vld [vmem:[%s4460_s24 + $0xb0] sm:$0xff] }
 0x6cd   : > { %v1154_v1 = vadd.f32 1e-06, %v1153_v27  ;;  %v3911_v27 = vld [vmem:[%s4460_s24 + $0xf0] sm:$0xff] }
 0x6cf   : > { %4120 = vrcp.f32 %v1154_v1  ;;  %v3887_v1 = vld [vmem:[%s4460_s24 + $0x30] sm:$0xff] }
 0x6d5   : > { %v4121_v31 = vpop.eup %4120 }
 0x6d6   : > { %v1160_v32 = vmul.f32 %v4121_v31, %v1159_v29  ;;  %v3902_v29 = vld [vmem:[%s4460_s24 + $0xa8] sm:$0xff] }
 0x6d7   : > { %v3886_v31 = vld [vmem:[%s4460_s24 + $0x28] sm:$0xff] }
 0x6d8   : > { %v1164_v38 = vadd.f32 %v4094_v30, %v1160_v32  ;;  %v3910_v30 = vld [vmem:[%s4460_s24 + $0xe8] sm:$0xff] }
 0x6d9   : > { %v3894_v32 = vld [vmem:[%s4460_s24 + $0x68] sm:$0xff] }
 0x6da   : > { %v4613_v41 = vpack.c.bf16 %v1164_v38, %v1164_v38  ;;  %v3908_v38 = vld [vmem:[%s4460_s24 + $0xd8] sm:$0xff] }
 0x6dc   : > { %3308 = vmatmul.msk.bf16.vlgmr.msra.gmra.mxu2 %vm752_vm1, %v4613_v41  ;;  %3309 = vmatmul.msk.bf16.vlgmr.msra.gmra.mxu3 %vm752_vm1, %v4613_v41 }
 0x6dd   : > { %3310 = vmatmul.msk.bf16.vlgmr.msrb.gmra.mxu0 %vm752_vm1, %v4613_v41  ;;  %3311 = vmatmul.msk.bf16.vlgmr.msrb.gmra.mxu1 %vm752_vm1, %v4613_v41 }
 0x6de   : > { %1507 = vmatpush.bf16.msra.mxu2 %v3279_v42  ;;  %1520 = vmatpush.bf16.msra.mxu3 %v3283_v43  ;;  %v3907_v42 = vld [vmem:[%s4460_s24 + $0xd0] sm:$0xff] }
 0x6df   : > { %1533 = vmatpush.bf16.msrb.mxu0 %v3287_v46  ;;  %1546 = vmatpush.bf16.msrb.mxu1 %v3291_v47  ;;  %v3883_v43 = vld [vmem:[%s4460_s24 + $0x10] sm:$0xff]  ;;  %v3882_v46 = vld [vmem:[%s4460_s24 + $0x8] sm:$0xff] }
 0x6e0   : > { %v3890_v47 = vld [vmem:[%s4460_s24 + $0x48] sm:$0xff] }
 0x6e2   : > { %1508 = vmatpush.bf16.msra.mxu2 %v3215_v54  ;;  %1521 = vmatpush.bf16.msra.mxu3 %v3219_v55  ;;  %v3920_v54 = vld [vmem:[%s4460_s24 + $0x138] sm:$0xff] }
 0x6e3   : > { %1534 = vmatpush.bf16.msrb.mxu0 %v3223_v56  ;;  %1547 = vmatpush.bf16.msrb.mxu1 %v3227_v57  ;;  %v3928_v55 = vld [vmem:[%s4460_s24 + $0x178] sm:$0xff]  ;;  %v3935_v56 = vld [vmem:[%s4460_s24 + $0x1b0] sm:$0xff] }
 0x6e4   : > { %v3943_v57 = vld [vmem:[%s4460_s24 + $0x1f0] sm:$0xff] }
 0x6ec   : > { %3312 = vmatmul.msk.bf16.vlgmr.msrb.gmra.mxu2 %vm752_vm1, %v4613_v41  ;;  %3313 = vmatmul.msk.bf16.vlgmr.msrb.gmra.mxu3 %vm752_vm1, %v4613_v41 }
 0x6ed   : > { %3314 = vmatmul.msk.bf16.vlgmr.msra.gmra.mxu0 %vm752_vm1, %v4613_v41  ;;  %3315 = vmatmul.msk.bf16.vlgmr.msra.gmra.mxu1 %vm752_vm1, %v4613_v41 }
 0x6ee   : > { %1559 = vmatpush.bf16.msrb.mxu2 %v3295_v3  ;;  %1572 = vmatpush.bf16.msrb.mxu3 %v3299_v4  ;;  %v3917_v3 = vld [vmem:[%s4460_s24 + $0x120] sm:$0xff] }
 0x6ef   : > { %1585 = vmatpush.bf16.msra.mxu0 %v3303_v7  ;;  %1598 = vmatpush.bf16.msra.mxu1 %v3307_v8  ;;  %v3925_v4 = vld [vmem:[%s4460_s24 + $0x160] sm:$0xff]  ;;  %v3931_v7 = vld [vmem:[%s4460_s24 + $0x190] sm:$0xff] }
 0x6f0   : > { %v3939_v8 = vld [vmem:[%s4460_s24 + $0x1d0] sm:$0xff] }
 0x6f2   : > { %1560 = vmatpush.bf16.msrb.mxu2 %v3231_v16  ;;  %1573 = vmatpush.bf16.msrb.mxu3 %v3235_v17  ;;  %v3929_v16 = vld [vmem:[%s4460_s24 + $0x180] sm:$0xff] }
 0x6f3   : > { %1586 = vmatpush.bf16.msra.mxu0 %v3239_v18  ;;  %1599 = vmatpush.bf16.msra.mxu1 %v3243_v19  ;;  %v3937_v17 = vld [vmem:[%s4460_s24 + $0x1c0] sm:$0xff]  ;;  %v3914_v18 = vld [vmem:[%s4460_s24 + $0x108] sm:$0xff] }
 0x6f4   : > { %v3922_v19 = vld [vmem:[%s4460_s24 + $0x148] sm:$0xff] }
 0x6fc   : > { %3316 = vmatmul.msk.bf16.vlgmr.msra.gmra.mxu2 %vm752_vm1, %v4613_v41  ;;  %3317 = vmatmul.msk.bf16.vlgmr.msra.gmra.mxu3 %vm752_vm1, %v4613_v41 }
 0x6fd   : > { %3318 = vmatmul.msk.bf16.vlgmr.msrb.gmra.mxu0 %vm752_vm1, %v4613_v41  ;;  %3319 = vmatmul.msk.bf16.vlgmr.msrb.gmra.mxu1 %vm752_vm1, %v4613_v41 }
 0x6fe   : > { %2691 = vmatpush.bf16.msrb.mxu0 %v3904_v20  ;;  %2704 = vmatpush.bf16.msrb.mxu1 %v3912_v22  ;;  %v3913_v20 = vld [vmem:[%s4460_s24 + $0x100] sm:$0xff] }
 0x6ff   : > { %2665 = vmatpush.bf16.msra.mxu2 %v3888_v23  ;;  %2678 = vmatpush.bf16.msra.mxu3 %v3896_v24  ;;  %v3921_v22 = vld [vmem:[%s4460_s24 + $0x140] sm:$0xff] }
 0x700   : > { %v4736_v23 = vld [vmem:[%s4450_s6] sm:$0xff] }
 0x701   : > { %v1204_v24 = vperm.slane %v4736_v23, 2 }
 0x702   : > { %2692 = vmatpush.bf16.msrb.mxu0 %v3903_v25  ;;  %2705 = vmatpush.bf16.msrb.mxu1 %v3911_v27  ;;  %v1205_v25 = vperm.slane %v4736_v23, 3 }
 0x703   : > { %2666 = vmatpush.bf16.msra.mxu2 %v3887_v1  ;;  %2679 = vmatpush.bf16.msra.mxu3 %v3895_v28 }
 0x706   : > { %2693 = vmatpush.bf16.msrb.mxu0 %v3902_v29  ;;  %2706 = vmatpush.bf16.msrb.mxu1 %v3910_v30  ;;  %v1202_v30 = vperm.slane %v4736_v23, 0 }
 0x707   : > { %2667 = vmatpush.bf16.msra.mxu2 %v3886_v31  ;;  %2680 = vmatpush.bf16.msra.mxu3 %v3894_v32  ;;  %v1203_v31 = vperm.slane %v4736_v23, 1 }
 0x70a   : > { %2694 = vmatpush.bf16.msrb.mxu0 %v3901_v33  ;;  %2707 = vmatpush.bf16.msrb.mxu1 %v3909_v34  ;;  %v3968_v34 = vld [vmem:[%s4460_s24 + $0x2b8] sm:$0xff] }
 0x70b   : > { %2668 = vmatpush.bf16.msra.mxu2 %v3885_v35  ;;  %2681 = vmatpush.bf16.msra.mxu3 %v3893_v36  ;;  %v3976_v35 = vld [vmem:[%s4460_s24 + $0x2f8] sm:$0xff] }
 0x70c   : > { %3320 = vmatmul.msk.bf16.vlgmr.msrb.gmra.mxu2 %vm752_vm1, %v4613_v41  ;;  %3321 = vmatmul.msk.bf16.vlgmr.msrb.gmra.mxu3 %vm752_vm1, %v4613_v41 }
 0x70d   : > { %3322 = vmatmul.msk.bf16.vlgmr.msra.gmra.mxu0 %vm752_vm1, %v4613_v41  ;;  %3323 = vmatmul.msk.bf16.vlgmr.msra.gmra.mxu1 %vm752_vm1, %v4613_v41  ;;  %v3906_v41 = vld [vmem:[%s4460_s24 + $0xc8] sm:$0xff] }
 0x70e   : > { %2695 = vmatpush.bf16.msrb.mxu0 %v3900_v37  ;;  %2708 = vmatpush.bf16.msrb.mxu1 %v3908_v38 }
 0x70f   : > { %2669 = vmatpush.bf16.msra.mxu2 %v3884_v26  ;;  %2682 = vmatpush.bf16.msra.mxu3 %v3892_v39 }
 0x712   : > { %2696 = vmatpush.bf16.msrb.mxu0 %v3899_v40  ;;  %2709 = vmatpush.bf16.msrb.mxu1 %v3907_v42 }
 0x713   : > { %2670 = vmatpush.bf16.msra.mxu2 %v3883_v43  ;;  %2683 = vmatpush.bf16.msra.mxu3 %v3891_v44 }
 0x716   : > { %2697 = vmatpush.bf16.msrb.mxu0 %v3898_v45  ;;  %2710 = vmatpush.bf16.msrb.mxu1 %v3906_v41  ;;  %v3967_v41 = vld [vmem:[%s4460_s24 + $0x2b0] sm:$0xff] }
 0x717   : > { %2671 = vmatpush.bf16.msra.mxu2 %v3882_v46  ;;  %2684 = vmatpush.bf16.msra.mxu3 %v3890_v47  ;;  %v3975_v46 = vld [vmem:[%s4460_s24 + $0x2f0] sm:$0xff] }
 0x71a   : > { %2698 = vmatpush.bf16.msrb.mxu0 %v3897_v48  ;;  %2711 = vmatpush.bf16.msrb.mxu1 %v3905_v49  ;;  %v3952_v49 = vld [vmem:[%s4460_s24 + $0x238] sm:$0xff] }
 0x71b   : > { %2672 = vmatpush.bf16.msra.mxu2 %v3881_v52  ;;  %2685 = vmatpush.bf16.msra.mxu3 %v3889_v53  ;;  %v3974_v52 = vld [vmem:[%s4460_s24 + $0x2e8] sm:$0xff] }
 0x71e   : > { %2743 = vmatpush.bf16.msra.mxu0 %v3936_v50  ;;  %2756 = vmatpush.bf16.msra.mxu1 %v3944_v51  ;;  %v3960_v50 = vld [vmem:[%s4460_s24 + $0x278] sm:$0xff]  ;;  %v3966_v51 = vld [vmem:[%s4460_s24 + $0x2a8] sm:$0xff] }
 0x71f   : > { %2717 = vmatpush.bf16.msrb.mxu2 %v3920_v54  ;;  %2730 = vmatpush.bf16.msrb.mxu3 %v3928_v55  ;;  %v1208_v55 = vperm.slane %v4736_v23, 6 }
 0x722   : > { %2744 = vmatpush.bf16.msra.mxu0 %v3935_v56  ;;  %2757 = vmatpush.bf16.msra.mxu1 %v3943_v57  ;;  %v1209_v56 = vperm.slane %v4736_v23, 7  ;;  %v3951_v57 = vld [vmem:[%s4460_s24 + $0x230] sm:$0xff] }
 0x723   : > { %2718 = vmatpush.bf16.msrb.mxu2 %v3919_v58  ;;  %2731 = vmatpush.bf16.msrb.mxu3 %v3927_v59  ;;  %v3959_v58 = vld [vmem:[%s4460_s24 + $0x270] sm:$0xff] }
 0x726   : > { %2745 = vmatpush.bf16.msra.mxu0 %v3934_v60  ;;  %2758 = vmatpush.bf16.msra.mxu1 %v3942_v61  ;;  %v3965_v61 = vld [vmem:[%s4460_s24 + $0x2a0] sm:$0xff] }
 0x727   : > { %2719 = vmatpush.bf16.msrb.mxu2 %v3918_v62  ;;  %2732 = vmatpush.bf16.msrb.mxu3 %v3926_v63  ;;  %v3973_v62 = vld [vmem:[%s4460_s24 + $0x2e0] sm:$0xff] }
 0x72a   : > { %2746 = vmatpush.bf16.msra.mxu0 %v3933_v0  ;;  %2759 = vmatpush.bf16.msra.mxu1 %v3941_v2  ;;  %v3950_v2 = vld [vmem:[%s4460_s24 + $0x228] sm:$0xff] }
 0x72b   : > { %2720 = vmatpush.bf16.msrb.mxu2 %v3917_v3  ;;  %2733 = vmatpush.bf16.msrb.mxu3 %v3925_v4  ;;  %v3958_v3 = vld [vmem:[%s4460_s24 + $0x268] sm:$0xff]  ;;  %v1206_v4 = vperm.slane %v4736_v23, 4 }
 0x72e   : > { %2747 = vmatpush.bf16.msra.mxu0 %v3932_v5  ;;  %2760 = vmatpush.bf16.msra.mxu1 %v3940_v6  ;;  %v1207_v5 = vperm.slane %v4736_v23, 5 }
 0x72f   : > { %2721 = vmatpush.bf16.msrb.mxu2 %v3916_v10  ;;  %2734 = vmatpush.bf16.msrb.mxu3 %v3924_v11  ;;  %v3972_v10 = vld [vmem:[%s4460_s24 + $0x2d8] sm:$0xff] }
 0x732   : > { %2748 = vmatpush.bf16.msra.mxu0 %v3931_v7  ;;  %2761 = vmatpush.bf16.msra.mxu1 %v3939_v8  ;;  %v3964_v8 = vld [vmem:[%s4460_s24 + $0x298] sm:$0xff] }
 0x733   : > { %2722 = vmatpush.bf16.msrb.mxu2 %v3915_v14  ;;  %2735 = vmatpush.bf16.msrb.mxu3 %v3923_v15 }
 0x736   : > { %2749 = vmatpush.bf16.msra.mxu0 %v3930_v12  ;;  %2762 = vmatpush.bf16.msra.mxu1 %v3938_v13 }
 0x737   : > { %2723 = vmatpush.bf16.msrb.mxu2 %v3914_v18  ;;  %2736 = vmatpush.bf16.msrb.mxu3 %v3922_v19  ;;  %v3957_v18 = vld [vmem:[%s4460_s24 + $0x260] sm:$0xff] }
 0x73a   : > { %2750 = vmatpush.bf16.msra.mxu0 %v3929_v16  ;;  %2763 = vmatpush.bf16.msra.mxu1 %v3937_v17  ;;  %v3949_v17 = vld [vmem:[%s4460_s24 + $0x220] sm:$0xff] }
 0x73b   : > { %2724 = vmatpush.bf16.msrb.mxu2 %v3913_v20  ;;  %2737 = vmatpush.bf16.msrb.mxu3 %v3921_v22 }
 0x75a   : > { %v1432_v27 = vpop.f32.mrf.mxu0  ;;  %v1445_v1 = vpop.f32.mrf.mxu1 }
 0x75b   : > { %v1433_v28 = vadd.f32 %v1432_v27, %v1204_v24  ;;  %v1446_v29 = vadd.f32 %v1445_v1, %v1205_v25  ;;  %v3963_v24 = vld [vmem:[%s4460_s24 + $0x290] sm:$0xff] }
 0x75c   : > { %v3971_v25 = vld [vmem:[%s4460_s24 + $0x2d0] sm:$0xff] }
 0x75d   : > { %v1607_v32 = vmax.f32 %v1433_v28, 0.0  ;;  %v1608_v33 = vmax.f32 %v1446_v29, 0.0  ;;  %v3948_v28 = vld [vmem:[%s4460_s24 + $0x218] sm:$0xff] }
 0x75e   : > { %v3956_v29 = vld [vmem:[%s4460_s24 + $0x258] sm:$0xff] }
 0x75f   : > { %v1623_v36 = vpack.c.bf16 %v1607_v32, %v1607_v32  ;;  %v1624_v37 = vpack.c.bf16 %v1608_v33, %v1608_v33  ;;  %v1406_v38 = vpop.f32.mrf.mxu2  ;;  %v1419_v26 = vpop.f32.mrf.mxu3  ;;  %v3970_v32 = vld [vmem:[%s4460_s24 + $0x2c8] sm:$0xff] }
 0x760   : > { %v1407_v39 = vadd.f32 %v1406_v38, %v1202_v30  ;;  %v1420_v40 = vadd.f32 %v1419_v26, %v1203_v31  ;;  %v4769_v30 = vld [vmem:[%s4450_s6 + $0x8] sm:$0xff]  ;;  %v3955_v38 = vld [vmem:[%s4460_s24 + $0x250] sm:$0xff] }
 0x761   : > { %2699 = vmatmul.bf16.vlgmr.msrb.gmra.mxu0 %v1623_v36  ;;  %2712 = vmatmul.bf16.vlgmr.msrb.gmra.mxu1 %v1624_v37  ;;  %v3962_v31 = vld [vmem:[%s4460_s24 + $0x288] sm:$0xff]  ;;  %v1213_v36 = vperm.slane %v4769_v30, 3  ;;  %v3947_v37 = vld [vmem:[%s4460_s24 + $0x210] sm:$0xff] }
 0x762   : > { %v1605_v42 = vmax.f32 %v1407_v39, 0.0  ;;  %v1606_v43 = vmax.f32 %v1420_v40, 0.0  ;;  %2795 = vmatpush.bf16.msrb.mxu0 %v3968_v34  ;;  %2808 = vmatpush.bf16.msrb.mxu1 %v3976_v35  ;;  %v1434_v44 = vpop.f32.mrf.mxu0  ;;  %v1447_v45 = vpop.f32.mrf.mxu1  ;;  %v1212_v35 = vperm.slane %v4769_v30, 2  ;;  %v3961_v40 = vld [vmem:[%s4460_s24 + $0x280] sm:$0xff] }
 0x763   : > { %v4000_v45 = vld [vmem:[%s4460_s24 + $0x3b8] sm:$0xff] }
 0x764   : > { %v1621_v47 = vpack.c.bf16 %v1605_v42, %v1605_v42  ;;  %v1622_v48 = vpack.c.bf16 %v1606_v43, %v1606_v43  ;;  %v3969_v42 = vld [vmem:[%s4460_s24 + $0x2c0] sm:$0xff] }
 0x766   : > { %2796 = vmatpush.bf16.msrb.mxu0 %v3967_v41  ;;  %2809 = vmatpush.bf16.msrb.mxu1 %v3975_v46  ;;  %v4008_v41 = vld [vmem:[%s4460_s24 + $0x3f8] sm:$0xff]  ;;  %v3946_v46 = vld [vmem:[%s4460_s24 + $0x208] sm:$0xff] }
 0x767   : > { %2673 = vmatmul.bf16.vlgmr.msra.gmra.mxu2 %v1621_v47  ;;  %2686 = vmatmul.bf16.vlgmr.msra.gmra.mxu3 %v1622_v48  ;;  %v1408_v53 = vpop.f32.mrf.mxu2  ;;  %v1421_v54 = vpop.f32.mrf.mxu3  ;;  %v3954_v47 = vld [vmem:[%s4460_s24 + $0x248] sm:$0xff]  ;;  %v1210_v48 = vperm.slane %v4769_v30, 0 }
 0x768   : > { %2769 = vmatpush.bf16.msra.mxu2 %v3952_v49  ;;  %2782 = vmatpush.bf16.msra.mxu3 %v3960_v50  ;;  %v1211_v49 = vperm.slane %v4769_v30, 1 }
 0x76a   : > { %2797 = vmatpush.bf16.msrb.mxu0 %v3966_v51  ;;  %2810 = vmatpush.bf16.msrb.mxu1 %v3974_v52  ;;  %v1484_v59 = vpop.f32.mrf.mxu0  ;;  %v1497_v60 = vpop.f32.mrf.mxu1 }
 0x76b   : > { %v1485_v63 = vadd.f32 %v1484_v59, %v1208_v55  ;;  %v1498_v0 = vadd.f32 %v1497_v60, %v1209_v56  ;;  %v3999_v56 = vld [vmem:[%s4460_s24 + $0x3b0] sm:$0xff]  ;;  %v3945_v60 = vld [vmem:[%s4460_s24 + $0x200] sm:$0xff] }
 0x76c   : > { %2770 = vmatpush.bf16.msra.mxu2 %v3951_v57  ;;  %2783 = vmatpush.bf16.msra.mxu3 %v3959_v58  ;;  %v4007_v57 = vld [vmem:[%s4460_s24 + $0x3f0] sm:$0xff] }
 0x76d   : > { %v1611_v6 = vmax.f32 %v1485_v63, 0.0  ;;  %v1612_v7 = vmax.f32 %v1498_v0, 0.0  ;;  %v3992_v63 = vld [vmem:[%s4460_s24 + $0x378] sm:$0xff] }
 0x76e   : > { %2798 = vmatpush.bf16.msrb.mxu0 %v3965_v61  ;;  %2811 = vmatpush.bf16.msrb.mxu1 %v3973_v62  ;;  %v3953_v61 = vld [vmem:[%s4460_s24 + $0x240] sm:$0xff]  ;;  %v3984_v62 = vld [vmem:[%s4460_s24 + $0x338] sm:$0xff] }
 0x76f   : > { %v1627_v11 = vpack.c.bf16 %v1611_v6, %v1611_v6  ;;  %v1628_v12 = vpack.c.bf16 %v1612_v7, %v1612_v7  ;;  %v1458_v13 = vpop.f32.mrf.mxu2  ;;  %v1471_v14 = vpop.f32.mrf.mxu3  ;;  %v4006_v6 = vld [vmem:[%s4460_s24 + $0x3e8] sm:$0xff] }
 0x770   : > { %2771 = vmatpush.bf16.msra.mxu2 %v3950_v2  ;;  %2784 = vmatpush.bf16.msra.mxu3 %v3958_v3  ;;  %v1459_v15 = vadd.f32 %v1458_v13, %v1206_v4  ;;  %v1472_v16 = vadd.f32 %v1471_v14, %v1207_v5  ;;  %v3998_v5 = vld [vmem:[%s4460_s24 + $0x3a8] sm:$0xff]  ;;  %v3997_v14 = vld [vmem:[%s4460_s24 + $0x3a0] sm:$0xff] }
 0x771   : > { %2751 = vmatmul.bf16.vlgmr.msra.gmra.mxu0 %v1627_v11  ;;  %2764 = vmatmul.bf16.vlgmr.msra.gmra.mxu1 %v1628_v12  ;;  %v3991_v11 = vld [vmem:[%s4460_s24 + $0x370] sm:$0xff] }
 0x772   : > { %v1609_v19 = vmax.f32 %v1459_v15, 0.0  ;;  %v1610_v20 = vmax.f32 %v1472_v16, 0.0  ;;  %2799 = vmatpush.bf16.msrb.mxu0 %v3964_v8  ;;  %2812 = vmatpush.bf16.msrb.mxu1 %v3972_v10  ;;  %v1486_v22 = vpop.f32.mrf.mxu0  ;;  %v1499_v23 = vpop.f32.mrf.mxu1  ;;  %v3983_v10 = vld [vmem:[%s4460_s24 + $0x330] sm:$0xff]  ;;  %v4005_v15 = vld [vmem:[%s4460_s24 + $0x3e0] sm:$0xff]  ;;  %v3982_v16 = vld [vmem:[%s4460_s24 + $0x328] sm:$0xff] }
 0x773   : > { %v4004_v22 = vld [vmem:[%s4460_s24 + $0x3d8] sm:$0xff]  ;;  %v3981_v23 = vld [vmem:[%s4460_s24 + $0x320] sm:$0xff] }
 0x774   : > { %v1625_v27 = vpack.c.bf16 %v1609_v19, %v1609_v19  ;;  %v1626_v1 = vpack.c.bf16 %v1610_v20, %v1610_v20  ;;  %2772 = vmatpush.bf16.msra.mxu2 %v3949_v17  ;;  %2785 = vmatpush.bf16.msra.mxu3 %v3957_v18  ;;  %v3990_v17 = vld [vmem:[%s4460_s24 + $0x368] sm:$0xff]  ;;  %v3996_v20 = vld [vmem:[%s4460_s24 + $0x398] sm:$0xff] }
 0x776   : > { %2800 = vmatpush.bf16.msrb.mxu0 %v3963_v24  ;;  %2813 = vmatpush.bf16.msrb.mxu1 %v3971_v25  ;;  %v3989_v24 = vld [vmem:[%s4460_s24 + $0x360] sm:$0xff] }
 0x777   : > { %2725 = vmatmul.bf16.vlgmr.msrb.gmra.mxu2 %v1625_v27  ;;  %2738 = vmatmul.bf16.vlgmr.msrb.gmra.mxu3 %v1626_v1  ;;  %v1460_v33 = vpop.f32.mrf.mxu2  ;;  %v1473_v34 = vpop.f32.mrf.mxu3  ;;  %v3995_v1 = vld [vmem:[%s4460_s24 + $0x390] sm:$0xff] }
 0x778   : > { %2773 = vmatpush.bf16.msra.mxu2 %v3948_v28  ;;  %2786 = vmatpush.bf16.msra.mxu3 %v3956_v29  ;;  %v4003_v28 = vld [vmem:[%s4460_s24 + $0x3d0] sm:$0xff]  ;;  %v1216_v29 = vperm.slane %v4769_v30, 6  ;;  %v3988_v33 = vld [vmem:[%s4460_s24 + $0x358] sm:$0xff] }
 0x77a   : > { %2801 = vmatpush.bf16.msrb.mxu0 %v3962_v31  ;;  %2814 = vmatpush.bf16.msrb.mxu1 %v3970_v32  ;;  %v1536_v26 = vpop.f32.mrf.mxu0  ;;  %v1549_v39 = vpop.f32.mrf.mxu1  ;;  %v1217_v31 = vperm.slane %v4769_v30, 7  ;;  %v3980_v32 = vld [vmem:[%s4460_s24 + $0x318] sm:$0xff] }
 0x77b   : > { %v1537_v43 = vadd.f32 %v1536_v26, %v1212_v35  ;;  %v1550_v44 = vadd.f32 %v1549_v39, %v1213_v36  ;;  %v3994_v36 = vld [vmem:[%s4460_s24 + $0x388] sm:$0xff]  ;;  %v3979_v39 = vld [vmem:[%s4460_s24 + $0x310] sm:$0xff] }
 0x77c   : > { %2774 = vmatpush.bf16.msra.mxu2 %v3947_v37  ;;  %2787 = vmatpush.bf16.msra.mxu3 %v3955_v38  ;;  %v4002_v37 = vld [vmem:[%s4460_s24 + $0x3c8] sm:$0xff] }
 0x77d   : > { %v1615_v50 = vmax.f32 %v1537_v43, 0.0  ;;  %v1616_v51 = vmax.f32 %v1550_v44, 0.0  ;;  %v1215_v43 = vperm.slane %v4769_v30, 5 }
 0x77e   : > { %2802 = vmatpush.bf16.msrb.mxu0 %v3961_v40  ;;  %2815 = vmatpush.bf16.msrb.mxu1 %v3969_v42  ;;  %v3987_v40 = vld [vmem:[%s4460_s24 + $0x350] sm:$0xff]  ;;  %v1214_v42 = vperm.slane %v4769_v30, 4 }
 0x77f   : > { %v1631_v52 = vpack.c.bf16 %v1615_v50, %v1615_v50  ;;  %v1632_v53 = vpack.c.bf16 %v1616_v51, %v1616_v51  ;;  %v1510_v54 = vpop.f32.mrf.mxu2  ;;  %v1523_v55 = vpop.f32.mrf.mxu3  ;;  %v3986_v50 = vld [vmem:[%s4460_s24 + $0x348] sm:$0xff] }
 0x780   : > { %2775 = vmatpush.bf16.msra.mxu2 %v3946_v46  ;;  %2788 = vmatpush.bf16.msra.mxu3 %v3954_v47  ;;  %v1511_v58 = vadd.f32 %v1510_v54, %v1210_v48  ;;  %v1524_v59 = vadd.f32 %v1523_v55, %v1211_v49  ;;  %v4001_v46 = vld [vmem:[%s4460_s24 + $0x3c0] sm:$0xff]  ;;  %v3978_v49 = vld [vmem:[%s4460_s24 + $0x308] sm:$0xff] }
 0x781   : > { %2803 = vmatmul.bf16.vlgmr.msrb.gmra.mxu0 %v1631_v52  ;;  %2816 = vmatmul.bf16.vlgmr.msrb.gmra.mxu1 %v1632_v53  ;;  %v3977_v54 = vld [vmem:[%s4460_s24 + $0x300] sm:$0xff] }
 0x782   : > { %2847 = vmatpush.bf16.msra.mxu0 %v4000_v45  ;;  %2860 = vmatpush.bf16.msra.mxu1 %v4008_v41  ;;  %v1613_v0 = vmax.f32 %v1511_v58, 0.0  ;;  %v1614_v2 = vmax.f32 %v1524_v59, 0.0  ;;  %v1538_v3 = vpop.f32.mrf.mxu0  ;;  %v1551_v4 = vpop.f32.mrf.mxu1  ;;  %v3993_v41 = vld [vmem:[%s4460_s24 + $0x380] sm:$0xff] }
 0x783   : > { %v3985_v55 = vld [vmem:[%s4460_s24 + $0x340] sm:$0xff] }
 0x784   : > { %v1629_v7 = vpack.c.bf16 %v1613_v0, %v1613_v0  ;;  %v1630_v8 = vpack.c.bf16 %v1614_v2, %v1614_v2  ;;  %2776 = vmatpush.bf16.msra.mxu2 %v3945_v60  ;;  %2789 = vmatpush.bf16.msra.mxu3 %v3953_v61 }
 0x786   : > { %2848 = vmatpush.bf16.msra.mxu0 %v3999_v56  ;;  %2861 = vmatpush.bf16.msra.mxu1 %v4007_v57 }
 0x787   : > { %v1512_v12 = vpop.f32.mrf.mxu2  ;;  %v1525_v13 = vpop.f32.mrf.mxu3  ;;  %2777 = vmatmul.bf16.vlgmr.msra.gmra.mxu2 %v1629_v7  ;;  %2790 = vmatmul.bf16.vlgmr.msra.gmra.mxu3 %v1630_v8 }
 0x788   : > { %2821 = vmatpush.bf16.msrb.mxu2 %v3984_v62  ;;  %2834 = vmatpush.bf16.msrb.mxu3 %v3992_v63 }
 0x78a   : > { %2849 = vmatpush.bf16.msra.mxu0 %v3998_v5  ;;  %2862 = vmatpush.bf16.msra.mxu1 %v4006_v6  ;;  %v1588_v18 = vpop.f32.mrf.mxu0  ;;  %v1601_v19 = vpop.f32.mrf.mxu1 }
 0x78b   : > { %v1589_v38 = vadd.f32 %v1588_v18, %v1216_v29  ;;  %v1602_v26 = vadd.f32 %v1601_v19, %v1217_v31 }
 0x78c   : > { %2822 = vmatpush.bf16.msrb.mxu2 %v3983_v10  ;;  %2835 = vmatpush.bf16.msrb.mxu3 %v3991_v11  ;;  %v4095_v10 = vld [vmem:[%s740_s14] ss:$0 sm:$0xff] }
 0x78d   : > { %v1619_v47 = vmax.f32 %v1589_v38, 0.0  ;;  %v1620_v48 = vmax.f32 %v1602_v26, 0.0 }
 0x78e   : > { %2850 = vmatpush.bf16.msra.mxu0 %v3997_v14  ;;  %2863 = vmatpush.bf16.msra.mxu1 %v4005_v15 }
 0x78f   : > { %v1562_v25 = vpop.f32.mrf.mxu2  ;;  %v1575_v27 = vpop.f32.mrf.mxu3  ;;  %v1635_v53 = vpack.c.bf16 %v1619_v47, %v1619_v47  ;;  %v1636_v30 = vpack.c.bf16 %v1620_v48, %v1620_v48 }
 0x790   : > { %2823 = vmatpush.bf16.msrb.mxu2 %v3982_v16  ;;  %2836 = vmatpush.bf16.msrb.mxu3 %v3990_v17  ;;  %v1563_v51 = vadd.f32 %v1562_v25, %v1214_v42  ;;  %v1576_v52 = vadd.f32 %v1575_v27, %v1215_v43 }
 0x792   : > { %2851 = vmatpush.bf16.msra.mxu0 %v3996_v20  ;;  %2864 = vmatpush.bf16.msra.mxu1 %v4004_v22  ;;  %v1590_v34 = vpop.f32.mrf.mxu0  ;;  %v1603_v35 = vpop.f32.mrf.mxu1  ;;  %v1617_v56 = vmax.f32 %v1563_v51, 0.0  ;;  %v1618_v57 = vmax.f32 %v1576_v52, 0.0 }
 0x794   : > { %2824 = vmatpush.bf16.msrb.mxu2 %v3981_v23  ;;  %2837 = vmatpush.bf16.msrb.mxu3 %v3989_v24  ;;  %v1633_v58 = vpack.c.bf16 %v1617_v56, %v1617_v56  ;;  %v1634_v59 = vpack.c.bf16 %v1618_v57, %v1618_v57 }
 0x796   : > { %2852 = vmatpush.bf16.msra.mxu0 %v3995_v1  ;;  %2865 = vmatpush.bf16.msra.mxu1 %v4003_v28 }
 0x797   : > { %v1564_v44 = vpop.f32.mrf.mxu2  ;;  %v1577_v45 = vpop.f32.mrf.mxu3 }
 0x798   : > { %2825 = vmatpush.bf16.msrb.mxu2 %v3980_v32  ;;  %2838 = vmatpush.bf16.msrb.mxu3 %v3988_v33 }
 0x79a   : > { %2853 = vmatpush.bf16.msra.mxu0 %v3994_v36  ;;  %2866 = vmatpush.bf16.msra.mxu1 %v4002_v37 }
 0x79c   : > { %2826 = vmatpush.bf16.msrb.mxu2 %v3979_v39  ;;  %2839 = vmatpush.bf16.msrb.mxu3 %v3987_v40 }
 0x79e   : > { %2854 = vmatpush.bf16.msra.mxu0 %v3993_v41  ;;  %2867 = vmatpush.bf16.msra.mxu1 %v4001_v46 }
 0x7a0   : > { %2827 = vmatpush.bf16.msrb.mxu2 %v3978_v49  ;;  %2840 = vmatpush.bf16.msrb.mxu3 %v3986_v50 }
 0x7a1   : > { %2855 = vmatmul.bf16.vlgmr.msra.gmra.mxu0 %v1635_v53  ;;  %2868 = vmatmul.bf16.vlgmr.msra.gmra.mxu1 %v1636_v30 }
 0x7a4   : > { %2828 = vmatpush.bf16.msrb.mxu2 %v3977_v54  ;;  %2841 = vmatpush.bf16.msrb.mxu3 %v3985_v55 }
 0x7a7   : > { %2829 = vmatmul.bf16.vlgmr.msrb.gmra.mxu2 %v1633_v58  ;;  %2842 = vmatmul.bf16.vlgmr.msrb.gmra.mxu3 %v1634_v59 }
 0x7de   : > { %v2700_v60 = vpop.f32.mrf.mxu0  ;;  %v2713_v61 = vpop.f32.mrf.mxu1 }
 0x7e6   : > { %v2702_v62 = vpop.f32.mrf.mxu0  ;;  %v2715_v63 = vpop.f32.mrf.mxu1 }
 0x7ea   : > { %v2674_v0 = vpop.f32.mrf.mxu2  ;;  %v2687_v2 = vpop.f32.mrf.mxu3 }
 0x7eb   : > { %v2675_v13 = vadd.f32 %v4095_v10, %v2674_v0 }
 0x7ed   : > { %v2688_v16 = vadd.f32 %v2687_v2, %v2675_v13 }
 0x7ee   : > { %v2752_v3 = vpop.f32.mrf.mxu0  ;;  %v2765_v4 = vpop.f32.mrf.mxu1 }
 0x7ef   : > { %v2701_v19 = vadd.f32 %v2700_v60, %v2688_v16 }
 0x7f1   : > { %v2714_v23 = vadd.f32 %v2713_v61, %v2701_v19 }
 0x7f2   : > { %v2676_v5 = vpop.f32.mrf.mxu2  ;;  %v2689_v6 = vpop.f32.mrf.mxu3 }
 0x7f6   : > { %v2754_v7 = vpop.f32.mrf.mxu0  ;;  %v2767_v8 = vpop.f32.mrf.mxu1 }
 0x7fa   : > { %v2726_v11 = vpop.f32.mrf.mxu2  ;;  %v2739_v12 = vpop.f32.mrf.mxu3 }
 0x7fb   : > { %v2727_v27 = vadd.f32 %v2726_v11, %v2714_v23 }
 0x7fd   : > { %v2740_v1 = vadd.f32 %v2739_v12, %v2727_v27 }
 0x7fe   : > { %v2804_v14 = vpop.f32.mrf.mxu0  ;;  %v2817_v15 = vpop.f32.mrf.mxu1 }
 0x7ff   : > { %v2753_v31 = vadd.f32 %v2752_v3, %v2740_v1 }
 0x801   : > { %v2766_v32 = vadd.f32 %v2765_v4, %v2753_v31 }
 0x802   : > { %v2728_v17 = vpop.f32.mrf.mxu2  ;;  %v2741_v18 = vpop.f32.mrf.mxu3 }
 0x806   : > { %v2806_v20 = vpop.f32.mrf.mxu0  ;;  %v2819_v22 = vpop.f32.mrf.mxu1 }
 0x80a   : > { %v2778_v24 = vpop.f32.mrf.mxu2  ;;  %v2791_v25 = vpop.f32.mrf.mxu3 }
 0x80b   : > { %v2779_v33 = vadd.f32 %v2778_v24, %v2766_v32 }
 0x80d   : > { %v2792_v36 = vadd.f32 %v2791_v25, %v2779_v33 }
 0x80f   : > { %v2805_v37 = vadd.f32 %v2804_v14, %v2792_v36 }
 0x811   : > { %v2818_v39 = vadd.f32 %v2817_v15, %v2805_v37 }
 0x812   : > { %v2780_v28 = vpop.f32.mrf.mxu2  ;;  %v2793_v29 = vpop.f32.mrf.mxu3 }
 0x81e   : > { %v2856_v34 = vpop.f32.mrf.mxu0  ;;  %v2869_v35 = vpop.f32.mrf.mxu1 }
 0x826   : > { %v2858_v38 = vpop.f32.mrf.mxu0  ;;  %v2871_v26 = vpop.f32.mrf.mxu1 }
 0x82a   : > { %v2830_v40 = vpop.f32.mrf.mxu2  ;;  %v2843_v42 = vpop.f32.mrf.mxu3 }
 0x82b   : > { %v2831_v43 = vadd.f32 %v2830_v40, %v2818_v39 }
 0x82d   : > { %v2844_v44 = vadd.f32 %v2843_v42, %v2831_v43 }
 0x82f   : > { %v2857_v45 = vadd.f32 %v2856_v34, %v2844_v44 }
 0x831   : > { %v2870_v41 = vadd.f32 %v2869_v35, %v2857_v45  ;;  %2878 = sbr.rel (%p3836_p1) target bundleno = 2379 (0x94b), region = 92 }
 0x832   : > { %v2832_v46 = vpop.f32.mrf.mxu2  ;;  %v2845_v47 = vpop.f32.mrf.mxu3 }
 0x833   : > { %v2873_v48 = vadd.f32 %v2870_v41, %v4542_v21 }
 0x835   : > { %2874 = vst.msk [vmem:[#allocation2] sm:$0xff] %vm752_vm1, %v2873_v48 }
 0x836   : > { %v2881_v49 = vsel %vm752_vm1, %v2873_v48, 0.0  ;;  %v4122_v2 = vld [vmem:[%s4960_s18] ss:$0 sm:$0xff] }
 0x837   : > { %2882 = vadd.xlane.f32.xlu0 %v2881_v49  ;;  %v4123_v4 = vld [vmem:[%s4961_s1] ss:$0 sm:$0xff] }
 0x8aa   : > { %v2883_v50 = vpop.xlane.xlu0 %2882 }
 0x8ab   : > { %v2884_v51 = vmul.f32 %v2883_v50, %v4468_v9 }
 0x8ad   : > { %v2885_v52 = vsub.f32 %v2873_v48, %v2884_v51 }
 0x8af   : > { %v2886_v53 = vmul.f32 %v2885_v52, %v2885_v52  ;;  %v2908_v3 = vmul.f32 %v4122_v2, %v2885_v52 }
 0x8b1   : > { %v2887_v30 = vsel %vm752_vm1, %v2886_v53, 0.0 }
 0x8b2   : > { %2888 = vadd.xlane.f32.xlu0 %v2887_v30 }
 0x925   : > { %v2889_v54 = vpop.xlane.xlu0 %2888 }
 0x926   : > { %v2890_v55 = vmul.f32 0.032258064, %v2889_v54 }
 0x928   : > { %4124 = vrsqrt.f32 %v2890_v55  ;;  %vm2898_vm11 = vcmp.eq.f32.partialorder %v2890_v55, inf  ;;  %v2901_v62 = vand.u32 2147483648, %v2890_v55  ;;  %vm2900_vm12 = vcmp.eq.f32.partialorder %v2890_v55, 0.0 }
 0x92e   : > { %v4125_v21 = vpop.eup %4124 }
 0x92f   : > { %v2892_v56 = vmul.f32 %v4125_v21, %v2890_v55 }
 0x931   : > { %v2893_v57 = vmul.f32 %v4125_v21, %v2892_v56 }
 0x933   : > { %v2894_v58 = vmul.f32 0.5, %v2893_v57 }
 0x935   : > { %v2895_v59 = vsub.f32 1.5, %v2894_v58 }
 0x937   : > { %v2896_v60 = vmul.f32 %v4125_v21, %v2895_v59 }
 0x939   : > { %v2897_v61 = vmul.f32 %v2896_v60, %v2890_v55 }
 0x93b   : > { %v2899_v63 = vsel %vm2898_vm11, %v2890_v55, %v2897_v61 }
 0x93c   : > { %v2902_v9 = vsel %vm2900_vm12, %v2901_v62, %v2899_v63 }
 0x93d   : > { %v2903_v0 = vadd.f32 1e-06, %v2902_v9 }
 0x93f   : > { %4126 = vrcp.f32 %v2903_v0 }
 0x945   : > { %v4127_v5 = vpop.eup %4126 }
 0x946   : > { %v2909_v6 = vmul.f32 %v4127_v5, %v2908_v3 }
 0x948   : > { %v2913_v7 = vadd.f32 %v4123_v4, %v2909_v6 }
 0x94a   : > { %2914 = vst.msk [vmem:[%s687_s17] sm:$0xff] %vm752_vm1, %v2913_v7 }
 0x94b PF: > { %s4962_s4 = sld [smem:[#allocation10_spill]]  ;;  %s2928_s29 = sshll.u32 %s687_s17, 4  ;;  %s2929_s29 = int_to_ptr.vmem [resolvable:$true] %s2928_s29 }
 0x94c   : > { %s4963_s9 = sld [smem:[#allocation7_spill]] }
 0x94d   : > { %s4965_s15 = sld [smem:[#allocation28_spill]] }
 0x951   : > { %s3838_s19 = sshll.u32 %s4962_s4, 3 }
 0x952   : > { %s4966_s20 = sand.u32 1, %s4963_s9  }
 0x953   : > { %s2926_s27 = scalar_lea.hbm %s4965_s15, %s3838_s19  ;;  %s2916_s22 = scalar_lea.sflag [#allocation4], %s4966_s20 }
 0x954   : > { %s2930_s0 = sshll.u32 %s2926_s27, 4  ;;  %s4148_s24 = scalar_lea.hbm %s4965_s15, 16  ;;  %s2931_s0 = int_to_ptr.hbm [resolvable:$true] %s2930_s0 }
 0x955   : > { %s4142_s6 = sshra.s32 %s2931_s0, 4  ;;  %s4143_s6 = int_to_ptr.hbm [resolvable:$true] %s4142_s6 }
 0x956   : > { %s4144_s28 = scalar_lea.hbm %s4143_s6, 8  ;;  %p4149_p6 = scmp.lt.s32.totalorder %s4143_s6, %s4965_s15 }
 0x957   : > { %p4145_p2 = scmp.ne.s32.totalorder %s4143_s6, %s4144_s28  ;;  %p4150_p7 = scmp.lt.s32.totalorder %s4148_s24, %s4144_s28 }
 0x959   : > { %p4146_p4 = pnand %p4145_p2, %p4367_p3  ;;  %p4151_p8 = por %p4150_p7, %p4149_p6 }
 0x95b   : > { %p4147_p5 = pneg %p4146_p4 }
 0x95d   : > { %p4152_p10 = pnand %p4151_p8, %p4147_p5 }
 0x95f   : > { %4155 = shalt.err (!%p4152_p10)
}
 0x960   : > { %4009 = dma.vmem_to_hbm [thread:$0]  (%p4367_p3), %s2929_s29, 128, %s2931_s0, %s2916_s22  }
 0x961 PF: > { %s4967_s26 = sld [smem:[#allocation13_spill]] }
 0x962   : > { %s4968_s17 = sld [smem:[#allocation6_spill]] }
 0x967   : > { %p4015_p11 = scmp.ge.s32.totalorder %s4967_s26, 2 }
 0x968   : > { %s2942_s1 = sand.u32 1, %s4968_s17  }
 0x969   : > { %p4012_p12 = pnand %p4015_p11, %p4377_p9  ;;  %s2943_s4 = scalar_lea.sflag [#allocation4], %s2942_s1 }
 0x96b   : > { %p4013_p13 = pneg %p4012_p12 }
 0x96d   : > { %4189 = dma.done.wait (%p4013_p13), %s2943_s4, 128  }
 0x96e   : > { %4191 = vsyncadd (%p4013_p13), %s2943_s4, 4294967168  ;;  %s29_s28 = sadd.s32 1, %s4967_s26   ;;  %s4970_s21 = sld [smem:[#allocation7_spill]] }
 0x96f   : > { %p26_p0 = scmp.ge.s32.totalorder %s29_s28, 6   ;;  %s4971_s22 = sld [smem:[#allocation8_spill]] }
 0x970   : > { %s4972_s23 = sld [smem:[#allocation18_spill]] }
 0x971   : > { %s4973_s24 = sld [smem:[#allocation11_spill]]  ;;  %28 = sbr.rel (!%p26_p0) target bundleno = 15 (0xf), region = 166 }
 0x972   : > { %s4974_s25 = sld [smem:[#allocation12_spill]] }
 0x973   : > { %s4975_s26 = sld [smem:[#allocation14_spill]] }
 0x974   : > { %s4976_s27 = sld [smem:[#allocation16_spill]] }
 0x976   :  { %2949 = vsyncpa [#allocation4], 1 }
 0x977   :  { %2951 = vsyncpa [#allocation4 + $0x1], 1 }

</bundles_post_ra>
